<compile_context>
chip_gen: v6e
topology: v6e:2x2x1
jax: 0.10.0
libtpu: 0.0.40
codegen_flags: <defaults>
</compile_context>

<pallas_src>
import functools
import math

import jax
import jax.numpy as jnp
from jax.experimental import pallas as pl
from jax.experimental.pallas import tpu as pltpu


def _rup(x, m):
    return ((x + m - 1) // m) * m


# ----------------------------------------------------------------------------
# Fused kernel: one grid step = one ProjectInOut(LayerNormalize(CMAttention))
# block (+ residual) for all batch rows of one direction at one depth.
# ----------------------------------------------------------------------------
def _cross_attention_kernel(cls_ref, patch_ref, wmat_ref, vrow_ref, fslab_ref,
                            hs_ref, hst_ref, out_ref, *,
                            mem, n_patch, off_mk, off_smv, foff_wm, eps):
    d = pl.program_id(1)

    # depth == 0: load this direction's cls token into the VMEM-resident output
    # block; it then serves as the residual carry for the whole depth chain.
    @pl.when(d == 0)
    def _():
        out_ref[...] = cls_ref[...]

    cls_tok = out_ref[...]                               # (B, P) padded cls carry
    B, P = cls_tok.shape
    heads = hs_ref.shape[1]

    v = vrow_ref[...]                                    # (VR, P) packed row params
    pib, g, beta, lnw = v[0:1], v[1:2], v[2:3], v[3:4]
    bq, bk, bv = v[4:5], v[5:6], v[6:7]
    bo, pob = v[7:8], v[8:9]
    mk_all = v[off_mk:off_mk + 2 * mem]                  # (2*mem, P): [m_k ; Sm_k]
    smvf = v[off_smv:off_smv + mem]                      # (mem, P):   Sm_v

    # --- ProjectInOut.project_in + LayerNorm (stats over real lanes via lnw) ---
    x = jnp.dot(cls_tok, wmat_ref[:, 0:P],
                preferred_element_type=jnp.float32) + pib
    mu = jnp.sum(x * lnw, axis=-1, keepdims=True)
    xc = x - mu
    var = jnp.sum(xc * xc * lnw, axis=-1, keepdims=True)
    xn = xc * jax.lax.rsqrt(var + eps) * g + beta        # padded lanes stay zero

    # --- fused q/k/v projection of the cls row (single MXU launch) -------------
    qkv = jnp.dot(xn, wmat_ref[:, P:4 * P], preferred_element_type=jnp.float32)
    q = qkv[:, 0:P] + bq                                 # (B, P)
    ks = qkv[:, P:2 * P] + bk
    vs = qkv[:, 2 * P:3 * P] + bv

    # --- key projection of the context patch tokens ----------------------------
    patches = patch_ref[...]                             # (B, np, P)
    kp = (jnp.dot(patches.reshape(B * n_patch, P), wmat_ref[:, 2 * P:3 * P],
                  preferred_element_type=jnp.float32) + bk
          ).reshape(B, n_patch, P)

    # --- per-head scores via the scaled one-hot head selector ------------------
    hs = hs_ref[...]                                     # (P, heads), scale folded in
    s_self = jnp.dot(q * ks, hs, preferred_element_type=jnp.float32)          # (B, H)
    s_patch = jnp.dot((kp * q[:, None, :]).reshape(B * n_patch, P), hs,
                      preferred_element_type=jnp.float32
                      ).reshape(B, n_patch, heads)                            # (B, np, H)
    s_memall = jnp.dot((mk_all[None, :, :] * q[:, None, :]).reshape(B * 2 * mem, P),
                       hs, preferred_element_type=jnp.float32
                       ).reshape(B, 2 * mem, heads)                           # (B, 2m, H)
    s_cmem = s_memall[:, :mem, :]                        # cross-memory scores
    s_smem = s_memall[:, mem:, :]                        # self-memory scores

    # --- cross softmax over keys [cls ; patches ; cross-memory] ----------------
    mx = jnp.maximum(s_self,
                     jnp.maximum(jnp.max(s_patch, axis=1), jnp.max(s_cmem, axis=1)))
    e_self = jnp.exp(s_self - mx)
    e_patch = jnp.exp(s_patch - mx[:, None, :])
    e_cmem = jnp.exp(s_cmem - mx[:, None, :])
    r = pl.reciprocal(e_self + jnp.sum(e_patch, axis=1) + jnp.sum(e_cmem, axis=1),
                      approx=False)
    p_self = e_self * r                                  # (B, H)
    p_patch = e_patch * r[:, None, :]                    # (B, np, H)
    p_cmem = e_cmem * r[:, None, :]                      # (B, mem, H)

    # --- self softmax over keys [cls ; self-memory] ----------------------------
    mxs = jnp.maximum(s_self, jnp.max(s_smem, axis=1))
    e0 = jnp.exp(s_self - mxs)
    em = jnp.exp(s_smem - mxs[:, None, :])
    rs = pl.reciprocal(e0 + jnp.sum(em, axis=1), approx=False)
    sp0 = e0 * rs                                        # (B, H)
    spm = em * rs[:, None, :]                            # (B, mem, H)

    # --- fuse_att on the cross probabilities (batched MXU contractions) --------
    fs = fslab_ref[...]
    wf_patch = fs[0:1 + mem, 0:n_patch]                             # (1+mem, np)
    wf_mem = fs[foff_wm:foff_wm + 1 + mem, 0:mem]                   # (1+mem, mem)
    bf_col = fs[foff_wm:foff_wm + 1 + mem, mem:mem + 1]             # (1+mem, 1)
    wc_col = fs[foff_wm:foff_wm + 1 + mem, mem + 1:mem + 2]         # (1+mem, 1)
    t_patch = jnp.einsum('boj,bjh->boh',
                         jnp.broadcast_to(wf_patch[None], (B, 1 + mem, n_patch)),
                         p_patch, preferred_element_type=jnp.float32)
    t_mem = jnp.einsum('boj,bjh->boh',
                       jnp.broadcast_to(wf_mem[None], (B, 1 + mem, mem)),
                       p_cmem, preferred_element_type=jnp.float32)
    fused = (p_self[:, None, :] * wc_col[None, :, :] + t_patch + t_mem
             + bf_col[None, :, :])                                  # (B, 1+mem, H)

    # --- (fuse + self) attention applied to [S_v ; self-memory values] ---------
    # cls row and memory rows handled separately: no concatenate / broadcast_to.
    hst = hst_ref[...]                                              # (heads, P)
    attn0 = fused[:, 0, :] + sp0                                    # (B, H)
    attnm = fused[:, 1:, :] + spm                                   # (B, mem, H)
    a0 = jnp.dot(attn0, hst, preferred_element_type=jnp.float32)                # (B, P)
    am = jnp.dot(attnm.reshape(B * mem, heads), hst,
                 preferred_element_type=jnp.float32).reshape(B, mem, P)
    o = a0 * vs + jnp.sum(am * smvf[None, :, :], axis=1)                        # (B, P)

    # --- to_out + ProjectInOut.project_out + residual ---------------------------
    o = jnp.dot(o, wmat_ref[:, 4 * P:5 * P], preferred_element_type=jnp.float32) + bo
    y = jnp.dot(o, wmat_ref[:, 5 * P:6 * P], preferred_element_type=jnp.float32) + pob
    out_ref[...] = (y + cls_tok).astype(out_ref.dtype)


# ----------------------------------------------------------------------------
# Host wrapper: pad/stack runtime inputs, one pallas_call for the full forward.
# ----------------------------------------------------------------------------
def cross_attention_forward(h_tokens, l_tokens, packed, *, cfg):
    B, n_tok, h_dim = h_tokens.shape
    s_dim = l_tokens.shape[-1]
    n_patch = n_tok - 1
    P, depth, heads, mem = cfg["P"], cfg["depth"], cfg["heads"], cfg["mem"]

    h_cls, h_patch = h_tokens[:, 0, :], h_tokens[:, 1:, :]
    l_cls, l_patch = l_tokens[:, 0, :], l_tokens[:, 1:, :]

    def pad_last(t):
        return jnp.pad(t, [(0, 0)] * (t.ndim - 1) + [(0, P - t.shape[-1])])

    cls_in = jnp.stack([pad_last(h_cls), pad_last(l_cls)], axis=0)          # (2, B, P)
    patches_in = jnp.stack([pad_last(l_patch), pad_last(h_patch)], axis=0)  # (2, B, np, P)

    kernel = functools.partial(
        _cross_attention_kernel, mem=mem, n_patch=n_patch,
        off_mk=cfg["off_mk"], off_smv=cfg["off_smv"], foff_wm=cfg["foff_wm"],
        eps=1e-5)

    out = pl.pallas_call(
        kernel,
        grid=(2, depth),
        in_specs=[
            pl.BlockSpec((None, B, P), lambda i, j: (i, 0, 0)),
            pl.BlockSpec((None, B, n_patch, P), lambda i, j: (i, 0, 0, 0)),
            pl.BlockSpec((None, None, P, 6 * P), lambda i, j: (i, j, 0, 0)),
            pl.BlockSpec((None, None, cfg["VR"], P), lambda i, j: (i, j, 0, 0)),
            pl.BlockSpec((None, None, cfg["FR"], cfg["FC"]), lambda i, j: (i, j, 0, 0)),
            pl.BlockSpec((P, heads), lambda i, j: (0, 0)),
            pl.BlockSpec((heads, P), lambda i, j: (0, 0)),
        ],
        out_specs=pl.BlockSpec((None, B, P), lambda i, j: (i, 0, 0)),
        out_shape=jax.ShapeDtypeStruct((2, B, P), jnp.float32),
        compiler_params=pltpu.CompilerParams(
            dimension_semantics=("parallel", "arbitrary")),
    )(cls_in, patches_in, packed["wmat"], packed["vrow"], packed["fslab"],
      packed["hsel"], packed["hselt"])

    h_cls_new = out[0, :, :h_dim][:, None, :]
    l_cls_new = out[1, :, :s_dim][:, None, :]
    return (jnp.concatenate([h_cls_new, h_patch], axis=1),
            jnp.concatenate([l_cls_new, l_patch], axis=1))


# ----------------------------------------------------------------------------
# Host-side parameter packing: three tile-aligned slabs per (direction, depth).
# ----------------------------------------------------------------------------
def prep_cross_attention_params(layers, *, h_dim, s_dim, heads, dim_head, mem,
                                n_patch):
    inner = heads * dim_head
    P = _rup(max(h_dim, s_dim, inner), 128)
    scale = dim_head ** -0.5

    off_mk = 16
    off_smv = off_mk + _rup(2 * mem, 8)
    VR = _rup(off_smv + mem, 8)
    foff_wm = _rup(1 + mem, 8)
    FR = _rup(foff_wm + 1 + mem, 8)
    FC = _rup(max(n_patch, mem + 2), 128)

    def padm(w):
        r, c = w.shape
        return jnp.zeros((P, P), jnp.float32).at[:r, :c].set(w)

    def padv(w):
        w = w.reshape(-1)
        return jnp.zeros((P,), jnp.float32).at[:w.shape[0]].set(w)

    def flat_mem(t):   # (heads, mem, dh) -> (mem, P), lane index i = h*dh + d
        m = jnp.transpose(t, (1, 0, 2)).reshape(mem, inner)
        return jnp.zeros((mem, P), jnp.float32).at[:, :inner].set(m)

    def block_slabs(p, dim_in, dim):
        cma = p["cma"]
        if p["proj_in_w"] is None:
            piw, pib = jnp.eye(dim, dtype=jnp.float32), jnp.zeros((dim,), jnp.float32)
            pow_m, pob = jnp.eye(dim, dtype=jnp.float32), jnp.zeros((dim_in,), jnp.float32)
        else:
            piw, pib = p["proj_in_w"], p["proj_in_b"]
            pow_m, pob = p["proj_out_w"], p["proj_out_b"]

        wmat = jnp.concatenate(
            [padm(piw), padm(cma["wq"]), padm(cma["wkv"][:, :inner]),
             padm(cma["wkv"][:, inner:]), padm(cma["wo"]), padm(pow_m)], axis=1)

        lnw = (jnp.arange(P) < dim).astype(jnp.float32) / dim
        vrow = jnp.zeros((VR, P), jnp.float32)
        vrow = vrow.at[0:9].set(jnp.stack(
            [padv(pib), padv(p["ln_g"]), padv(p["ln_b"]), lnw,
             padv(cma["bq"]), padv(cma["bkv"][:, :inner]), padv(cma["bkv"][:, inner:]),
             padv(cma["bo"]), padv(pob)], axis=0))
        vrow = vrow.at[off_mk:off_mk + mem].set(flat_mem(cma["mk"]))
        vrow = vrow.at[off_mk + mem:off_mk + 2 * mem].set(flat_mem(cma["smk"]))
        vrow = vrow.at[off_smv:off_smv + mem].set(flat_mem(cma["smv"]))

        wft = cma["wft"]                               # (1+mem, 1+np+mem), torch (out,in)
        fslab = jnp.zeros((FR, FC), jnp.float32)
        fslab = fslab.at[0:1 + mem, 0:n_patch].set(wft[:, 1:1 + n_patch])
        fslab = fslab.at[foff_wm:foff_wm + 1 + mem, 0:mem].set(wft[:, 1 + n_patch:])
        fslab = fslab.at[foff_wm:foff_wm + 1 + mem, mem:mem + 1].set(cma["bf"])
        fslab = fslab.at[foff_wm:foff_wm + 1 + mem, mem + 1:mem + 2].set(wft[:, 0:1])
        return wmat, vrow, fslab

    dims = [(h_dim, s_dim), (s_dim, h_dim)]
    names = ["h_attend_l", "l_attend_h"]
    wm, vr, fl = [], [], []
    for dirn in range(2):
        w_l, v_l, f_l = [], [], []
        for lp in layers:
            a, b, c = block_slabs(lp[names[dirn]], *dims[dirn])
            w_l.append(a); v_l.append(b); f_l.append(c)
        wm.append(jnp.stack(w_l)); vr.append(jnp.stack(v_l)); fl.append(jnp.stack(f_l))

    lane = jnp.arange(P)
    onehot = ((lane[:, None] // dim_head == jnp.arange(heads)[None, :])
              & (lane[:, None] < inner)).astype(jnp.float32)
    packed = dict(wmat=jnp.stack(wm), vrow=jnp.stack(vr), fslab=jnp.stack(fl),
                  hsel=onehot * scale, hselt=onehot.T)
    cfg = dict(P=P, VR=VR, FR=FR, FC=FC, off_mk=off_mk, off_smv=off_smv,
               foff_wm=foff_wm, heads=heads, dim_head=dim_head, mem=mem,
               n_patch=n_patch, depth=len(layers))
    return packed, cfg


# ----------------------------------------------------------------------------
# Pure-JAX reference of the same math (for correctness checks).
# ----------------------------------------------------------------------------
def layer_norm(x, g, b, eps=1e-5):
    mu = jnp.mean(x, axis=-1, keepdims=True)
    var = jnp.mean((x - mu) ** 2, axis=-1, keepdims=True)
    return (x - mu) / jnp.sqrt(var + eps) * g + b


def cma_reference(inp, ctx, p, *, heads, dim_head, mem):
    B = inp.shape[0]
    inner = heads * dim_head
    scale = dim_head ** -0.5

    def split_heads(t):
        B_, N, _ = t.shape
        return t.reshape(B_, N, heads, dim_head).transpose(0, 2, 1, 3)

    q = split_heads(inp @ p["wq"] + p["bq"])
    kv_c = ctx @ p["wkv"] + p["bkv"]
    kv_s = inp @ p["wkv"] + p["bkv"]
    k_c = split_heads(kv_c[..., :inner])
    sk = split_heads(kv_s[..., :inner])
    sv = split_heads(kv_s[..., inner:])

    bc = lambda t: jnp.broadcast_to(t[None], (B, heads, mem, dim_head))
    k = jnp.concatenate([k_c, bc(p["mk"])], axis=2)
    Sk = jnp.concatenate([sk, bc(p["smk"])], axis=2)
    Sv = jnp.concatenate([sv, bc(p["smv"])], axis=2)

    cross = jax.nn.softmax(jnp.einsum("bhid,bhjd->bhij", q, k) * scale, axis=-1)
    selfa = jax.nn.softmax(jnp.einsum("bhid,bhjd->bhij", q, Sk) * scale, axis=-1)
    fused = jnp.einsum("bhij,oj->bhio", cross, p["wft"]) + p["bf"][:, 0]
    attn = fused + selfa
    out = jnp.einsum("bhij,bhjd->bhid", attn, Sv)
    out = out.transpose(0, 2, 1, 3).reshape(B, 1, inner)
    return out @ p["wo"] + p["bo"]


def block_forward_ref(cls_tok, patches, p, cfg):
    x = cls_tok
    if p["proj_in_w"] is not None:
        x = x @ p["proj_in_w"] + p["proj_in_b"]
    xn = layer_norm(x, p["ln_g"], p["ln_b"])
    ctx = jnp.concatenate([xn, patches], axis=1)              # kv_include_self
    out = cma_reference(xn, ctx, p["cma"], heads=cfg["heads"],
                        dim_head=cfg["dim_head"], mem=cfg["mem"])
    if p["proj_out_w"] is not None:
        out = out @ p["proj_out_w"] + p["proj_out_b"]
    return out + cls_tok


def cross_attention_forward_ref(h_tokens, l_tokens, layers, cfg):
    h_cls, h_patch = h_tokens[:, :1], h_tokens[:, 1:]
    l_cls, l_patch = l_tokens[:, :1], l_tokens[:, 1:]
    for lp in layers:
        h_cls = block_forward_ref(h_cls, l_patch, lp["h_attend_l"], cfg)
        l_cls = block_forward_ref(l_cls, h_patch, lp["l_attend_h"], cfg)
    return (jnp.concatenate([h_cls, h_patch], axis=1),
            jnp.concatenate([l_cls, l_patch], axis=1))


# ----------------------------------------------------------------------------
# Deterministic synthetic parameter initialization.
# ----------------------------------------------------------------------------
def _w(key, shape, s=0.05):
    return (s * jax.random.normal(key, shape)).astype(jnp.float32)


def init_cma_params(key, dim, heads, dim_head, mem, n_ctx):
    inner = heads * dim_head
    ks = jax.random.split(key, 11)
    # torch params m_k / Sm_k / Sm_v are (1, mem, inner); the expand+view in the
    # PyTorch forward is a flat row-major reinterpretation -> reshape(heads, mem, dh).
    m_k = _w(ks[4], (mem, inner))
    sm_k = _w(ks[5], (mem, inner))
    sm_v = _w(ks[6], (mem, inner))
    return dict(
        wq=_w(ks[0], (dim, inner)), bq=_w(ks[1], (1, inner), 0.01),
        wkv=_w(ks[2], (dim, 2 * inner)), bkv=_w(ks[3], (1, 2 * inner), 0.01),
        mk=(math.sqrt(dim_head) * m_k).reshape(heads, mem, dim_head),
        smk=(math.sqrt(dim_head) * sm_k).reshape(heads, mem, dim_head),
        smv=(math.sqrt(mem) * sm_v).reshape(heads, mem, dim_head),
        # fuse_att: Linear(n_ctx+mem -> 1+mem), stored torch-style (out, in)
        wft=_w(ks[7], (1 + mem, n_ctx + mem)), bf=_w(ks[8], (1 + mem, 1), 0.01),
        wo=_w(ks[9], (inner, dim)), bo=_w(ks[10], (1, dim), 0.01),
    )


def init_block_params(key, dim_in, dim_out, heads, dim_head, mem, n_ctx):
    ks = jax.random.split(key, 5)
    p = dict(
        ln_g=jnp.ones((dim_out,), jnp.float32),
        ln_b=jnp.zeros((dim_out,), jnp.float32),
        cma=init_cma_params(ks[2], dim_out, heads, dim_head, mem, n_ctx),
    )
    if dim_in != dim_out:
        p["proj_in_w"] = _w(ks[0], (dim_in, dim_out))
        p["proj_in_b"] = _w(ks[3], (1, dim_out), 0.01)
        p["proj_out_w"] = _w(ks[1], (dim_out, dim_in))
        p["proj_out_b"] = _w(ks[4], (1, dim_in), 0.01)
    else:
        p["proj_in_w"] = p["proj_in_b"] = None
        p["proj_out_w"] = p["proj_out_b"] = None
    return p


# ----------------------------------------------------------------------------
if __name__ == "__main__":
    B, heads, dim_head, mem = 2, 2, 16, 3
    h_dim, s_dim = 24, 32
    n_patch = 7                       # context length = 1 (cls) + n_patch = 8
    depth = 2
    n_ctx = 1 + n_patch
    cfg_ref = dict(heads=heads, dim_head=dim_head, mem=mem)

    key = jax.random.PRNGKey(0)
    k_h, k_l, k_p = jax.random.split(key, 3)
    h_tokens = jax.random.normal(k_h, (B, 1 + n_patch, h_dim), jnp.float32)
    l_tokens = jax.random.normal(k_l, (B, 1 + n_patch, s_dim), jnp.float32)

    layers = []
    for d in range(depth):
        kd = jax.random.fold_in(k_p, d)
        k1, k2 = jax.random.split(kd)
        layers.append(dict(
            h_attend_l=init_block_params(k1, h_dim, s_dim, heads, dim_head, mem, n_ctx),
            l_attend_h=init_block_params(k2, s_dim, h_dim, heads, dim_head, mem, n_ctx),
        ))

    packed, cfg = prep_cross_attention_params(
        layers, h_dim=h_dim, s_dim=s_dim, heads=heads, dim_head=dim_head,
        mem=mem, n_patch=n_patch)

    # Full Cross_Attention forward (eval mode, dropout = identity), one pallas_call.
    fwd = jax.jit(functools.partial(cross_attention_forward, cfg=cfg))
    h_out, l_out = fwd(h_tokens, l_tokens, packed)
    jax.block_until_ready((h_out, l_out))
    assert h_out.shape == h_tokens.shape and l_out.shape == l_tokens.shape

    h_ref, l_ref = cross_attention_forward_ref(h_tokens, l_tokens, layers, cfg_ref)
    assert jnp.allclose(h_out, h_ref, atol=5e-3, rtol=5e-3), "h_tokens mismatch"
    assert jnp.allclose(l_out, l_ref, atol=5e-3, rtol=5e-3), "l_tokens mismatch"

    print("KERNEL_OK")
</pallas_src>

<mosaic_0001>
module attributes {stable_mosaic.version = 11 : i64} {
  func.func @_cross_attention_kernel(%arg0: i32, %arg1: i32, %arg2: memref<1x2x128xf32, #tpu.memory_space<vmem>>, %arg3: memref<1x2x7x128xf32, #tpu.memory_space<vmem>>, %arg4: memref<1x1x128x768xf32, #tpu.memory_space<vmem>>, %arg5: memref<1x1x32x128xf32, #tpu.memory_space<vmem>>, %arg6: memref<1x1x16x128xf32, #tpu.memory_space<vmem>>, %arg7: memref<128x2xf32, #tpu.memory_space<vmem>>, %arg8: memref<2x128xf32, #tpu.memory_space<vmem>>, %arg9: memref<1x2x128xf32, #tpu.memory_space<vmem>>) attributes {dimension_semantics = [#tpu.dimension_semantics<parallel>, #tpu.dimension_semantics<arbitrary>], iteration_bounds = array<i64: 2, 2>, scalar_prefetch = 0 : i64, scratch_operands = 0 : i64, tpu.core_type = #tpu.core_type<tc>, window_params = [{transform_indices = @transform_0, window_bounds = array<i64: 1, 2, 128>}, {transform_indices = @transform_1, window_bounds = array<i64: 1, 2, 7, 128>}, {transform_indices = @transform_2, window_bounds = array<i64: 1, 1, 128, 768>}, {transform_indices = @transform_3, window_bounds = array<i64: 1, 1, 32, 128>}, {transform_indices = @transform_4, window_bounds = array<i64: 1, 1, 16, 128>}, {pipeline_mode = #tpu.pipeline_mode<synchronous>, transform_indices = @transform_5, window_bounds = array<i64: 128, 2>}, {pipeline_mode = #tpu.pipeline_mode<synchronous>, transform_indices = @transform_6, window_bounds = array<i64: 2, 128>}, {transform_indices = @transform_7, window_bounds = array<i64: 1, 2, 128>}]} {
    %c0_i32 = arith.constant 0 : i32
    %0 = arith.cmpi eq, %arg1, %c0_i32 : i32
    %1 = arith.extui %0 : i1 to i32
    %c0_i32_0 = arith.constant 0 : i32
    %2 = arith.cmpi ne, %1, %c0_i32_0 : i32
    scf.if %2 {
      %c0_59 = arith.constant 0 : index
      %c0_60 = arith.constant 0 : index
      %c0_61 = arith.constant 0 : index
      %178 = vector.load %arg2[%c0_59, %c0_60, %c0_61] : memref<1x2x128xf32, #tpu.memory_space<vmem>>, vector<1x2x128xf32>
      %179 = vector.shape_cast %178 : vector<1x2x128xf32> to vector<2x128xf32>
      %c0_62 = arith.constant 0 : index
      %c0_63 = arith.constant 0 : index
      %c0_64 = arith.constant 0 : index
      %180 = vector.load %arg9[%c0_62, %c0_63, %c0_64] : memref<1x2x128xf32, #tpu.memory_space<vmem>>, vector<1x2x128xf32>
      %181 = vector.shape_cast %180 : vector<1x2x128xf32> to vector<2x128xf32>
      %182 = vector.shape_cast %179 : vector<2x128xf32> to vector<1x2x128xf32>
      tpu.vector_store %arg9[%c0_62, %c0_63, %c0_64], %182 {strides = array<i32>} : memref<1x2x128xf32, #tpu.memory_space<vmem>>, vector<1x2x128xf32>,
    } else {
    }
    %c0 = arith.constant 0 : index
    %c0_1 = arith.constant 0 : index
    %c0_2 = arith.constant 0 : index
    %3 = vector.load %arg9[%c0, %c0_1, %c0_2] : memref<1x2x128xf32, #tpu.memory_space<vmem>>, vector<1x2x128xf32>
    %4 = vector.shape_cast %3 : vector<1x2x128xf32> to vector<2x128xf32>
    %c0_3 = arith.constant 0 : index
    %c0_4 = arith.constant 0 : index
    %c0_5 = arith.constant 0 : index
    %c0_6 = arith.constant 0 : index
    %5 = vector.load %arg5[%c0_3, %c0_4, %c0_5, %c0_6] : memref<1x1x32x128xf32, #tpu.memory_space<vmem>>, vector<1x1x32x128xf32>
    %6 = vector.shape_cast %5 : vector<1x1x32x128xf32> to vector<32x128xf32>
    %7 = vector.extract_strided_slice %6 {offsets = [0, 0], sizes = [1, 128], strides = [1, 1]} : vector<32x128xf32> to vector<1x128xf32>
    %8 = vector.extract_strided_slice %6 {offsets = [1, 0], sizes = [1, 128], strides = [1, 1]} : vector<32x128xf32> to vector<1x128xf32>
    %9 = vector.extract_strided_slice %6 {offsets = [2, 0], sizes = [1, 128], strides = [1, 1]} : vector<32x128xf32> to vector<1x128xf32>
    %10 = vector.extract_strided_slice %6 {offsets = [3, 0], sizes = [1, 128], strides = [1, 1]} : vector<32x128xf32> to vector<1x128xf32>
    %11 = vector.extract_strided_slice %6 {offsets = [4, 0], sizes = [1, 128], strides = [1, 1]} : vector<32x128xf32> to vector<1x128xf32>
    %12 = vector.extract_strided_slice %6 {offsets = [5, 0], sizes = [1, 128], strides = [1, 1]} : vector<32x128xf32> to vector<1x128xf32>
    %13 = vector.extract_strided_slice %6 {offsets = [6, 0], sizes = [1, 128], strides = [1, 1]} : vector<32x128xf32> to vector<1x128xf32>
    %14 = vector.extract_strided_slice %6 {offsets = [7, 0], sizes = [1, 128], strides = [1, 1]} : vector<32x128xf32> to vector<1x128xf32>
    %15 = vector.extract_strided_slice %6 {offsets = [8, 0], sizes = [1, 128], strides = [1, 1]} : vector<32x128xf32> to vector<1x128xf32>
    %16 = vector.extract_strided_slice %6 {offsets = [16, 0], sizes = [6, 128], strides = [1, 1]} : vector<32x128xf32> to vector<6x128xf32>
    %17 = vector.extract_strided_slice %6 {offsets = [24, 0], sizes = [3, 128], strides = [1, 1]} : vector<32x128xf32> to vector<3x128xf32>
    %c0_7 = arith.constant 0 : index
    %c0_8 = arith.constant 0 : index
    %c0_9 = arith.constant 0 : index
    %c0_10 = arith.constant 0 : index
    %18 = vector.load %arg4[%c0_7, %c0_8, %c0_9, %c0_10] : memref<1x1x128x768xf32, #tpu.memory_space<vmem>>, vector<1x1x128x128xf32>
    %19 = vector.shape_cast %18 : vector<1x1x128x128xf32> to vector<128x128xf32>
    %cst = arith.constant dense<0.000000e+00> : vector<2x128xf32>
    %20 = tpu.matmul %4, %19, %cst {dimension_numbers = #tpu.dot_dimension_numbers<[1], [0], [0], [1], [0, 0, 1, 1], [], []>} : vector<2x128xf32>, vector<128x128xf32>, vector<2x128xf32> -> vector<2x128xf32>
    %21 = vector.broadcast %7 : vector<1x128xf32> to vector<2x128xf32>
    %22 = arith.addf %20, %21 : vector<2x128xf32>
    %23 = vector.broadcast %10 : vector<1x128xf32> to vector<2x128xf32>
    %24 = arith.mulf %22, %23 : vector<2x128xf32>
    %cst_11 = arith.constant dense<0.000000e+00> : vector<2xf32>
    %25 = vector.multi_reduction <add>, %24, %cst_11 [1] : vector<2x128xf32> to vector<2xf32>
    %26 = vector.shape_cast %25 : vector<2xf32> to vector<2x1xf32>
    %27 = vector.broadcast %26 : vector<2x1xf32> to vector<2x128xf32>
    %28 = arith.subf %22, %27 : vector<2x128xf32>
    %29 = arith.mulf %28, %28 : vector<2x128xf32>
    %30 = vector.broadcast %10 : vector<1x128xf32> to vector<2x128xf32>
    %31 = arith.mulf %29, %30 : vector<2x128xf32>
    %cst_12 = arith.constant dense<0.000000e+00> : vector<2xf32>
    %32 = vector.multi_reduction <add>, %31, %cst_12 [1] : vector<2x128xf32> to vector<2xf32>
    %33 = vector.shape_cast %32 : vector<2xf32> to vector<2x1xf32>
    %cst_13 = arith.constant 9.99999974E-6 : f32
    %34 = vector.broadcast %cst_13 : f32 to vector<2x1xf32>
    %35 = arith.addf %33, %34 : vector<2x1xf32>
    %36 = math.rsqrt %35 : vector<2x1xf32>
    %37 = vector.broadcast %36 : vector<2x1xf32> to vector<2x128xf32>
    %38 = arith.mulf %28, %37 : vector<2x128xf32>
    %39 = vector.broadcast %8 : vector<1x128xf32> to vector<2x128xf32>
    %40 = arith.mulf %38, %39 : vector<2x128xf32>
    %41 = vector.broadcast %9 : vector<1x128xf32> to vector<2x128xf32>
    %42 = arith.addf %40, %41 : vector<2x128xf32>
    %c0_14 = arith.constant 0 : index
    %c0_15 = arith.constant 0 : index
    %c0_16 = arith.constant 0 : index
    %c128 = arith.constant 128 : index
    %43 = vector.load %arg4[%c0_14, %c0_15, %c0_16, %c128] : memref<1x1x128x768xf32, #tpu.memory_space<vmem>>, vector<1x1x128x384xf32>
    %44 = vector.shape_cast %43 : vector<1x1x128x384xf32> to vector<128x384xf32>
    %cst_17 = arith.constant dense<0.000000e+00> : vector<2x384xf32>
    %45 = tpu.matmul %42, %44, %cst_17 {dimension_numbers = #tpu.dot_dimension_numbers<[1], [0], [0], [1], [0, 0, 1, 1], [], []>} : vector<2x128xf32>, vector<128x384xf32>, vector<2x384xf32> -> vector<2x384xf32>
    %46 = vector.extract_strided_slice %45 {offsets = [0, 0], sizes = [2, 128], strides = [1, 1]} : vector<2x384xf32> to vector<2x128xf32>
    %47 = vector.broadcast %11 : vector<1x128xf32> to vector<2x128xf32>
    %48 = arith.addf %46, %47 : vector<2x128xf32>
    %49 = vector.extract_strided_slice %45 {offsets = [0, 128], sizes = [2, 128], strides = [1, 1]} : vector<2x384xf32> to vector<2x128xf32>
    %50 = vector.broadcast %12 : vector<1x128xf32> to vector<2x128xf32>
    %51 = arith.addf %49, %50 : vector<2x128xf32>
    %52 = vector.extract_strided_slice %45 {offsets = [0, 256], sizes = [2, 128], strides = [1, 1]} : vector<2x384xf32> to vector<2x128xf32>
    %53 = vector.broadcast %13 : vector<1x128xf32> to vector<2x128xf32>
    %54 = arith.addf %52, %53 : vector<2x128xf32>
    %c0_18 = arith.constant 0 : index
    %c0_19 = arith.constant 0 : index
    %c0_20 = arith.constant 0 : index
    %c0_21 = arith.constant 0 : index
    %55 = vector.load %arg3[%c0_18, %c0_19, %c0_20, %c0_21] : memref<1x2x7x128xf32, #tpu.memory_space<vmem>>, vector<1x2x7x128xf32>
    %56 = vector.shape_cast %55 : vector<1x2x7x128xf32> to vector<2x7x128xf32>
    %57 = vector.shape_cast %56 : vector<2x7x128xf32> to vector<14x128xf32>
    %c0_22 = arith.constant 0 : index
    %c0_23 = arith.constant 0 : index
    %c0_24 = arith.constant 0 : index
    %c256 = arith.constant 256 : index
    %58 = vector.load %arg4[%c0_22, %c0_23, %c0_24, %c256] : memref<1x1x128x768xf32, #tpu.memory_space<vmem>>, vector<1x1x128x128xf32>
    %59 = vector.shape_cast %58 : vector<1x1x128x128xf32> to vector<128x128xf32>
    %cst_25 = arith.constant dense<0.000000e+00> : vector<14x128xf32>
    %60 = tpu.matmul %57, %59, %cst_25 {dimension_numbers = #tpu.dot_dimension_numbers<[1], [0], [0], [1], [0, 0, 1, 1], [], []>} : vector<14x128xf32>, vector<128x128xf32>, vector<14x128xf32> -> vector<14x128xf32>
    %61 = vector.broadcast %12 : vector<1x128xf32> to vector<14x128xf32>
    %62 = arith.addf %60, %61 : vector<14x128xf32>
    %63 = vector.shape_cast %62 : vector<14x128xf32> to vector<2x7x128xf32>
    %c0_26 = arith.constant 0 : index
    %c0_27 = arith.constant 0 : index
    %64 = vector.load %arg7[%c0_26, %c0_27] : memref<128x2xf32, #tpu.memory_space<vmem>>, vector<128x2xf32>
    %65 = arith.mulf %48, %51 : vector<2x128xf32>
    %cst_28 = arith.constant dense<0.000000e+00> : vector<2x2xf32>
    %66 = tpu.matmul %65, %64, %cst_28 {dimension_numbers = #tpu.dot_dimension_numbers<[1], [0], [0], [1], [0, 0, 1, 1], [], []>} : vector<2x128xf32>, vector<128x2xf32>, vector<2x2xf32> -> vector<2x2xf32>
    %67 = vector.shape_cast %48 : vector<2x128xf32> to vector<2x1x128xf32>
    %68 = vector.broadcast %67 : vector<2x1x128xf32> to vector<2x7x128xf32>
    %69 = arith.mulf %63, %68 : vector<2x7x128xf32>
    %70 = vector.shape_cast %69 : vector<2x7x128xf32> to vector<14x128xf32>
    %cst_29 = arith.constant dense<0.000000e+00> : vector<14x2xf32>
    %71 = tpu.matmul %70, %64, %cst_29 {dimension_numbers = #tpu.dot_dimension_numbers<[1], [0], [0], [1], [0, 0, 1, 1], [], []>} : vector<14x128xf32>, vector<128x2xf32>, vector<14x2xf32> -> vector<14x2xf32>
    %72 = vector.shape_cast %71 : vector<14x2xf32> to vector<2x7x2xf32>
    %73 = vector.shape_cast %16 : vector<6x128xf32> to vector<1x6x128xf32>
    %74 = vector.shape_cast %48 : vector<2x128xf32> to vector<2x1x128xf32>
    %75 = vector.broadcast %73 : vector<1x6x128xf32> to vector<2x6x128xf32>
    %76 = vector.broadcast %74 : vector<2x1x128xf32> to vector<2x6x128xf32>
    %77 = arith.mulf %75, %76 : vector<2x6x128xf32>
    %78 = vector.shape_cast %77 : vector<2x6x128xf32> to vector<12x128xf32>
    %cst_30 = arith.constant dense<0.000000e+00> : vector<12x2xf32>
    %79 = tpu.matmul %78, %64, %cst_30 {dimension_numbers = #tpu.dot_dimension_numbers<[1], [0], [0], [1], [0, 0, 1, 1], [], []>} : vector<12x128xf32>, vector<128x2xf32>, vector<12x2xf32> -> vector<12x2xf32>
    %80 = vector.shape_cast %79 : vector<12x2xf32> to vector<2x6x2xf32>
    %81 = vector.extract_strided_slice %80 {offsets = [0, 0, 0], sizes = [2, 3, 2], strides = [1, 1, 1]} : vector<2x6x2xf32> to vector<2x3x2xf32>
    %82 = vector.extract_strided_slice %80 {offsets = [0, 3, 0], sizes = [2, 3, 2], strides = [1, 1, 1]} : vector<2x6x2xf32> to vector<2x3x2xf32>
    %cst_31 = arith.constant dense<0xFF800000> : vector<2x2xf32>
    %83 = vector.multi_reduction <maximumf>, %72, %cst_31 [1] : vector<2x7x2xf32> to vector<2x2xf32>
    %cst_32 = arith.constant dense<0xFF800000> : vector<2x2xf32>
    %84 = vector.multi_reduction <maximumf>, %81, %cst_32 [1] : vector<2x3x2xf32> to vector<2x2xf32>
    %85 = arith.maximumf %83, %84 : vector<2x2xf32>
    %86 = arith.maximumf %66, %85 : vector<2x2xf32>
    %87 = arith.subf %66, %86 : vector<2x2xf32>
    %88 = math.exp %87 : vector<2x2xf32>
    %89 = vector.shape_cast %86 : vector<2x2xf32> to vector<2x1x2xf32>
    %90 = vector.broadcast %89 : vector<2x1x2xf32> to vector<2x7x2xf32>
    %91 = arith.subf %72, %90 : vector<2x7x2xf32>
    %92 = math.exp %91 : vector<2x7x2xf32>
    %93 = vector.shape_cast %86 : vector<2x2xf32> to vector<2x1x2xf32>
    %94 = vector.broadcast %93 : vector<2x1x2xf32> to vector<2x3x2xf32>
    %95 = arith.subf %81, %94 : vector<2x3x2xf32>
    %96 = math.exp %95 : vector<2x3x2xf32>
    %cst_33 = arith.constant dense<0.000000e+00> : vector<2x2xf32>
    %97 = vector.multi_reduction <add>, %92, %cst_33 [1] : vector<2x7x2xf32> to vector<2x2xf32>
    %98 = arith.addf %88, %97 : vector<2x2xf32>
    %cst_34 = arith.constant dense<0.000000e+00> : vector<2x2xf32>
    %99 = vector.multi_reduction <add>, %96, %cst_34 [1] : vector<2x3x2xf32> to vector<2x2xf32>
    %100 = arith.addf %98, %99 : vector<2x2xf32>
    %101 = tpu.reciprocal %100 : vector<2x2xf32> -> vector<2x2xf32>
    %102 = arith.mulf %88, %101 : vector<2x2xf32>
    %103 = vector.shape_cast %101 : vector<2x2xf32> to vector<2x1x2xf32>
    %104 = vector.broadcast %103 : vector<2x1x2xf32> to vector<2x7x2xf32>
    %105 = arith.mulf %92, %104 : vector<2x7x2xf32>
    %106 = vector.shape_cast %101 : vector<2x2xf32> to vector<2x1x2xf32>
    %107 = vector.broadcast %106 : vector<2x1x2xf32> to vector<2x3x2xf32>
    %108 = arith.mulf %96, %107 : vector<2x3x2xf32>
    %cst_35 = arith.constant dense<0xFF800000> : vector<2x2xf32>
    %109 = vector.multi_reduction <maximumf>, %82, %cst_35 [1] : vector<2x3x2xf32> to vector<2x2xf32>
    %110 = arith.maximumf %66, %109 : vector<2x2xf32>
    %111 = arith.subf %66, %110 : vector<2x2xf32>
    %112 = math.exp %111 : vector<2x2xf32>
    %113 = vector.shape_cast %110 : vector<2x2xf32> to vector<2x1x2xf32>
    %114 = vector.broadcast %113 : vector<2x1x2xf32> to vector<2x3x2xf32>
    %115 = arith.subf %82, %114 : vector<2x3x2xf32>
    %116 = math.exp %115 : vector<2x3x2xf32>
    %cst_36 = arith.constant dense<0.000000e+00> : vector<2x2xf32>
    %117 = vector.multi_reduction <add>, %116, %cst_36 [1] : vector<2x3x2xf32> to vector<2x2xf32>
    %118 = arith.addf %112, %117 : vector<2x2xf32>
    %119 = tpu.reciprocal %118 : vector<2x2xf32> -> vector<2x2xf32>
    %120 = arith.mulf %112, %119 : vector<2x2xf32>
    %121 = vector.shape_cast %119 : vector<2x2xf32> to vector<2x1x2xf32>
    %122 = vector.broadcast %121 : vector<2x1x2xf32> to vector<2x3x2xf32>
    %123 = arith.mulf %116, %122 : vector<2x3x2xf32>
    %c0_37 = arith.constant 0 : index
    %c0_38 = arith.constant 0 : index
    %c0_39 = arith.constant 0 : index
    %c0_40 = arith.constant 0 : index
    %124 = vector.load %arg6[%c0_37, %c0_38, %c0_39, %c0_40] : memref<1x1x16x128xf32, #tpu.memory_space<vmem>>, vector<1x1x16x128xf32>
    %125 = vector.shape_cast %124 : vector<1x1x16x128xf32> to vector<16x128xf32>
    %126 = vector.extract_strided_slice %125 {offsets = [0, 0], sizes = [4, 7], strides = [1, 1]} : vector<16x128xf32> to vector<4x7xf32>
    %127 = vector.extract_strided_slice %125 {offsets = [8, 0], sizes = [4, 3], strides = [1, 1]} : vector<16x128xf32> to vector<4x3xf32>
    %128 = vector.extract_strided_slice %125 {offsets = [8, 3], sizes = [4, 1], strides = [1, 1]} : vector<16x128xf32> to vector<4x1xf32>
    %129 = vector.extract_strided_slice %125 {offsets = [8, 4], sizes = [4, 1], strides = [1, 1]} : vector<16x128xf32> to vector<4x1xf32>
    %130 = vector.shape_cast %126 : vector<4x7xf32> to vector<1x4x7xf32>
    %131 = vector.shape_cast %130 : vector<1x4x7xf32> to vector<1x4x7xf32>
    %132 = vector.broadcast %131 : vector<1x4x7xf32> to vector<2x4x7xf32>
    "tpu.trace_start"() <{level = 10 : i32, message = "boj,bjh->boh"}> : () -> ()
    %cst_41 = arith.constant dense<0.000000e+00> : vector<2x4x2xf32>
    %133 = tpu.matmul %132, %105, %cst_41 {dimension_numbers = #tpu.dot_dimension_numbers<[2], [1], [1], [2], [0, 0, 0, 1, 1, 2], [0], [0]>} : vector<2x4x7xf32>, vector<2x7x2xf32>, vector<2x4x2xf32> -> vector<2x4x2xf32>
    "tpu.trace_stop"() : () -> ()
    %134 = vector.shape_cast %127 : vector<4x3xf32> to vector<1x4x3xf32>
    %135 = vector.shape_cast %134 : vector<1x4x3xf32> to vector<1x4x3xf32>
    %136 = vector.broadcast %135 : vector<1x4x3xf32> to vector<2x4x3xf32>
    "tpu.trace_start"() <{level = 10 : i32, message = "boj,bjh->boh"}> : () -> ()
    %cst_42 = arith.constant dense<0.000000e+00> : vector<2x4x2xf32>
    %137 = tpu.matmul %136, %108, %cst_42 {dimension_numbers = #tpu.dot_dimension_numbers<[2], [1], [1], [2], [0, 0, 0, 1, 1, 2], [0], [0]>} : vector<2x4x3xf32>, vector<2x3x2xf32>, vector<2x4x2xf32> -> vector<2x4x2xf32>
    "tpu.trace_stop"() : () -> ()
    %138 = vector.shape_cast %102 : vector<2x2xf32> to vector<2x1x2xf32>
    %139 = vector.shape_cast %129 : vector<4x1xf32> to vector<1x4x1xf32>
    %140 = vector.broadcast %138 : vector<2x1x2xf32> to vector<2x4x2xf32>
    %141 = vector.broadcast %139 : vector<1x4x1xf32> to vector<2x4x2xf32>
    %142 = arith.mulf %140, %141 : vector<2x4x2xf32>
    %143 = arith.addf %142, %133 : vector<2x4x2xf32>
    %144 = arith.addf %143, %137 : vector<2x4x2xf32>
    %145 = vector.shape_cast %128 : vector<4x1xf32> to vector<1x4x1xf32>
    %146 = vector.broadcast %145 : vector<1x4x1xf32> to vector<2x4x2xf32>
    %147 = arith.addf %144, %146 : vector<2x4x2xf32>
    %c0_43 = arith.constant 0 : index
    %c0_44 = arith.constant 0 : index
    %148 = vector.load %arg8[%c0_43, %c0_44] : memref<2x128xf32, #tpu.memory_space<vmem>>, vector<2x128xf32>
    %149 = vector.extract_strided_slice %147 {offsets = [0, 0, 0], sizes = [2, 1, 2], strides = [1, 1, 1]} : vector<2x4x2xf32> to vector<2x1x2xf32>
    %150 = vector.shape_cast %149 : vector<2x1x2xf32> to vector<2x2xf32>
    %151 = arith.addf %150, %120 : vector<2x2xf32>
    %152 = vector.extract_strided_slice %147 {offsets = [0, 1, 0], sizes = [2, 3, 2], strides = [1, 1, 1]} : vector<2x4x2xf32> to vector<2x3x2xf32>
    %153 = arith.addf %152, %123 : vector<2x3x2xf32>
    %cst_45 = arith.constant dense<0.000000e+00> : vector<2x128xf32>
    %154 = tpu.matmul %151, %148, %cst_45 {dimension_numbers = #tpu.dot_dimension_numbers<[1], [0], [0], [1], [0, 0, 1, 1], [], []>} : vector<2x2xf32>, vector<2x128xf32>, vector<2x128xf32> -> vector<2x128xf32>
    %155 = vector.shape_cast %153 : vector<2x3x2xf32> to vector<6x2xf32>
    %cst_46 = arith.constant dense<0.000000e+00> : vector<6x128xf32>
    %156 = tpu.matmul %155, %148, %cst_46 {dimension_numbers = #tpu.dot_dimension_numbers<[1], [0], [0], [1], [0, 0, 1, 1], [], []>} : vector<6x2xf32>, vector<2x128xf32>, vector<6x128xf32> -> vector<6x128xf32>
    %157 = vector.shape_cast %156 : vector<6x128xf32> to vector<2x3x128xf32>
    %158 = arith.mulf %154, %54 : vector<2x128xf32>
    %159 = vector.shape_cast %17 : vector<3x128xf32> to vector<1x3x128xf32>
    %160 = vector.broadcast %159 : vector<1x3x128xf32> to vector<2x3x128xf32>
    %161 = arith.mulf %157, %160 : vector<2x3x128xf32>
    %cst_47 = arith.constant dense<0.000000e+00> : vector<2x128xf32>
    %162 = vector.multi_reduction <add>, %161, %cst_47 [1] : vector<2x3x128xf32> to vector<2x128xf32>
    %163 = arith.addf %158, %162 : vector<2x128xf32>
    %c0_48 = arith.constant 0 : index
    %c0_49 = arith.constant 0 : index
    %c0_50 = arith.constant 0 : index
    %c512 = arith.constant 512 : index
    %164 = vector.load %arg4[%c0_48, %c0_49, %c0_50, %c512] : memref<1x1x128x768xf32, #tpu.memory_space<vmem>>, vector<1x1x128x128xf32>
    %165 = vector.shape_cast %164 : vector<1x1x128x128xf32> to vector<128x128xf32>
    %cst_51 = arith.constant dense<0.000000e+00> : vector<2x128xf32>
    %166 = tpu.matmul %163, %165, %cst_51 {dimension_numbers = #tpu.dot_dimension_numbers<[1], [0], [0], [1], [0, 0, 1, 1], [], []>} : vector<2x128xf32>, vector<128x128xf32>, vector<2x128xf32> -> vector<2x128xf32>
    %167 = vector.broadcast %14 : vector<1x128xf32> to vector<2x128xf32>
    %168 = arith.addf %166, %167 : vector<2x128xf32>
    %c0_52 = arith.constant 0 : index
    %c0_53 = arith.constant 0 : index
    %c0_54 = arith.constant 0 : index
    %c640 = arith.constant 640 : index
    %169 = vector.load %arg4[%c0_52, %c0_53, %c0_54, %c640] : memref<1x1x128x768xf32, #tpu.memory_space<vmem>>, vector<1x1x128x128xf32>
    %170 = vector.shape_cast %169 : vector<1x1x128x128xf32> to vector<128x128xf32>
    %cst_55 = arith.constant dense<0.000000e+00> : vector<2x128xf32>
    %171 = tpu.matmul %168, %170, %cst_55 {dimension_numbers = #tpu.dot_dimension_numbers<[1], [0], [0], [1], [0, 0, 1, 1], [], []>} : vector<2x128xf32>, vector<128x128xf32>, vector<2x128xf32> -> vector<2x128xf32>
    %172 = vector.broadcast %15 : vector<1x128xf32> to vector<2x128xf32>
    %173 = arith.addf %171, %172 : vector<2x128xf32>
    %174 = arith.addf %173, %4 : vector<2x128xf32>
    %c0_56 = arith.constant 0 : index
    %c0_57 = arith.constant 0 : index
    %c0_58 = arith.constant 0 : index
    %175 = vector.load %arg9[%c0_56, %c0_57, %c0_58] : memref<1x2x128xf32, #tpu.memory_space<vmem>>, vector<1x2x128xf32>
    %176 = vector.shape_cast %175 : vector<1x2x128xf32> to vector<2x128xf32>
    %177 = vector.shape_cast %174 : vector<2x128xf32> to vector<1x2x128xf32>
    tpu.vector_store %arg9[%c0_56, %c0_57, %c0_58], %177 {strides = array<i32>} : memref<1x2x128xf32, #tpu.memory_space<vmem>>, vector<1x2x128xf32>,
    return
  }
  func.func @transform_0(%arg0: i32, %arg1: i32) -> (i32, i32, i32) {
    %c0_i32 = arith.constant 0 : i32
    %c0_i32_0 = arith.constant 0 : i32
    %c0_i32_1 = arith.constant 0 : i32
    return %arg0, %c0_i32, %c0_i32_0 : i32, i32, i32
  }
  func.func @transform_1(%arg0: i32, %arg1: i32) -> (i32, i32, i32, i32) {
    %c0_i32 = arith.constant 0 : i32
    %c0_i32_0 = arith.constant 0 : i32
    %c0_i32_1 = arith.constant 0 : i32
    %c0_i32_2 = arith.constant 0 : i32
    return %arg0, %c0_i32, %c0_i32_0, %c0_i32_1 : i32, i32, i32, i32
  }
  func.func @transform_2(%arg0: i32, %arg1: i32) -> (i32, i32, i32, i32) {
    %c0_i32 = arith.constant 0 : i32
    %c0_i32_0 = arith.constant 0 : i32
    %c0_i32_1 = arith.constant 0 : i32
    return %arg0, %arg1, %c0_i32, %c0_i32_0 : i32, i32, i32, i32
  }
  func.func @transform_3(%arg0: i32, %arg1: i32) -> (i32, i32, i32, i32) {
    %c0_i32 = arith.constant 0 : i32
    %c0_i32_0 = arith.constant 0 : i32
    %c0_i32_1 = arith.constant 0 : i32
    return %arg0, %arg1, %c0_i32, %c0_i32_0 : i32, i32, i32, i32
  }
  func.func @transform_4(%arg0: i32, %arg1: i32) -> (i32, i32, i32, i32) {
    %c0_i32 = arith.constant 0 : i32
    %c0_i32_0 = arith.constant 0 : i32
    %c0_i32_1 = arith.constant 0 : i32
    return %arg0, %arg1, %c0_i32, %c0_i32_0 : i32, i32, i32, i32
  }
  func.func @transform_5(%arg0: i32, %arg1: i32) -> (i32, i32) {
    %c0_i32 = arith.constant 0 : i32
    %c0_i32_0 = arith.constant 0 : i32
    %c0_i32_1 = arith.constant 0 : i32
    return %c0_i32, %c0_i32_0 : i32, i32
  }
  func.func @transform_6(%arg0: i32, %arg1: i32) -> (i32, i32) {
    %c0_i32 = arith.constant 0 : i32
    %c0_i32_0 = arith.constant 0 : i32
    %c0_i32_1 = arith.constant 0 : i32
    return %c0_i32, %c0_i32_0 : i32, i32
  }
  func.func @transform_7(%arg0: i32, %arg1: i32) -> (i32, i32, i32) {
    %c0_i32 = arith.constant 0 : i32
    %c0_i32_0 = arith.constant 0 : i32
    %c0_i32_1 = arith.constant 0 : i32
    return %arg0, %c0_i32, %c0_i32_0 : i32, i32, i32
  }
}

</mosaic_0001>

<bundles_post_ra>
// kernel: cross_attention_forward.1
= control target key start
LH: loop header
LB: loop body
LE: loop exit
PB: predicated region body
PF: predicated region fallthrough
CT: control target
= control target key end

     0   :  { %s6229_s0 = inlined_call_operand.vmem [shape: f32[2,2,128], index: 0, kind: input, shape index: {}]   ;;  %s6230_s1 = inlined_call_operand.vmem [shape: f32[2,2,7,128], index: 1, kind: input, shape index: {}]   ;;  %s6231_s2 = inlined_call_operand.hbm [shape: f32[2,2,128,768], index: 2, kind: input, shape index: {}]   ;;  %s6232_s3 = inlined_call_operand.hbm [shape: f32[2,2,32,128], index: 3, kind: input, shape index: {}]   ;;  %s6233_s4 = inlined_call_operand.hbm [shape: f32[2,2,16,128], index: 4, kind: input, shape index: {}]   ;;  %s6234_s5 = inlined_call_operand.vmem [shape: f32[128,2], index: 5, kind: input, shape index: {}]   ;;  %s6235_s6 = inlined_call_operand.hbm [shape: f32[2,128], index: 6, kind: input, shape index: {}]   ;;  %s6236_s7 = inlined_call_operand.vmem [shape: f32[2,2,128], index: 7, kind: output, shape index: {}]  }
   0x1   :  { %6244 = sst [smem:[#allocation15_spill]] %s6229_s0 }
   0x2   :  { %6245 = sst [smem:[#allocation16_spill]] %s6230_s1 }
   0x3   :  { %6246 = sst [smem:[#allocation17_spill]] %s6231_s2 }
   0x4   :  { %6247 = sst [smem:[#allocation18_spill]] %s6232_s3 }
   0x5   :  { %6248 = sst [smem:[#allocation19_spill]] %s6234_s5 }
   0x6   :  { %6249 = sst [smem:[#allocation20_spill]] %s6235_s6 }
   0x7   :  { %6250 = sst [smem:[#allocation21_spill]] %s6236_s7 }
   0x8   :  { %12 = vsyncpa [#allocation3], 0 }
   0x9   :  { %14 = vsyncpa [#allocation3 + $0x1], 0 }
   0xa   :  { %15 = vsyncpa [#allocation5], 0 }
   0xb   :  { %17 = vsyncpa [#allocation5 + $0x1], 0 }
   0xc   :  { %18 = vsyncpa [#allocation8], 0  ;;  %s5001_s24 = smov 0   ;;  %s5003_s25 = smov 0  }
   0xd   :  { %s5005_s26 = smov 0   ;;  %s5007_s27 = smov 0  }
   0xe   :  { %s5009_s28 = smov 0   ;;  %s5011_s29 = smov 0  }
   0xf   :  { %s5013_s30 = smov 0   ;;  %s5015_s8 = smov 0  }
  0x10 LB: > { %6251 = sst [smem:[#allocation12_spill]] %s4929_s27  ;;  %s33_s9 = sadd.s32 1, %s4937_s29  ;;  %s4945_s8 = sphi %s5015_s8, %s24_s8   ;;  %s4941_s30 = sphi %s5013_s30, %s6284_s30   ;;  %s4937_s29 = sphi %s5011_s29, %s6283_s29   ;;  %s4933_s28 = sphi %s5009_s28, %s6282_s28   ;;  %s4929_s27 = sphi %s5007_s27, %s6281_s27   ;;  %s4925_s26 = sphi %s5005_s26, %s6280_s26   ;;  %s4921_s25 = sphi %s5003_s25, %s6279_s25   ;;  %s4917_s24 = sphi %s5001_s24, %s6278_s24  }
  0x11   : > { %s36_s10 = sadd.s32 1, %s4941_s30  ;;  %p34_p0 = scmp.ge.s32.totalorder %s33_s9, 2 }
  0x12   : > { %s97_s11 = sadd.s32 1, %s4925_s26  ;;  %p104_p1 = scmp.ne.s32.totalorder %s4925_s26, %s4921_s25 }
  0x13   : > { %p105_p2 = scmp.eq.s32.totalorder %s4945_s8, 0  ;;  %s6286_s9 = smov (%p34_p0, %s33_s9), 0 }
  0x14   : > { %6252 = sst [smem:[#allocation13_spill]] %s6286_s9  ;;  %s6288_s10 = smov (!%p34_p0, %s36_s10), %s4941_s30 }
  0x15   : > { %s93_s12 = ssub.s32 %s4937_s29, %s6286_s9  ;;  %p106_p3 = por %p105_p2, %p104_p1 }
  0x16   : > { %p38_p4 = scmp.ge.s32.totalorder %s6288_s10, 2  ;;  %p4623_p5 = scmp.lt.s32.totalorder %s4945_s8, 4 }
  0x17   : > { %s5054_s13 = sand.u32 1, %s4925_s26   ;;  %s310_s15 = sand.u32 1, %s4945_s8  }
  0x18   : > { %s6290_s10 = smov (%p38_p4, %s6288_s10), 0  ;;  %p5058_p6 = pnand %p4623_p5, %p106_p3 }
  0x19   : > { %6253 = sst [smem:[#allocation14_spill]] %s6290_s10  ;;  %s92_s16 = ssub.s32 %s4941_s30, %s6290_s10 }
  0x1a   : > { %s94_s17 = sor.u32 %s93_s12, %s92_s16  ;;  %s4097_s18 = sshll.u32 %s5054_s13, 5 }
  0x1b   : > { %p95_p7 = scmp.eq.s32.totalorder %s94_s17, 0  ;;  %s4098_s19 = sshll.u32 %s4937_s29, 2 }
  0x1c   : > { %s4099_s21 = sshll.u32 %s4941_s30, 3  ;;  %s314_s22 = scalar_lea.vmem [#allocation4], %s4097_s18 }
  0x1d   : > { %s5068_s20 = scalar_select %p95_p7, %s4925_s26, %s97_s11  }
  0x1e   : > { %s323_s23 = sshll.u32 %s314_s22, 4  ;;  %s320_s9 = sadd.s32 %s4099_s21, %s4098_s19  ;;  %s324_s23 = int_to_ptr.vmem [resolvable:$true] %s323_s23 }
  0x1f   : > { %s4100_s5 = sshll.u32 %s320_s9, 7  ;;  %s6255_s3 = sld [smem:[#allocation18_spill]] }
  0x20   : > { %s5074_s0 = scalar_lea.sflag [#allocation5], %s310_s15  ;;  %p6239_p8 = pneg %p5058_p6 }
  0x21   : > { %s4774_s12 = scalar_lea.vmem %s324_s23, 512  ;;  %s4947_s11 = smov [#allocation4]  }
  0x22   : > { %p4775_p9 = scmp.ne.s32.totalorder %s324_s23, %s4774_s12  ;;  %s4779_s16 = sshll.u32 %s4947_s11, 4  ;;  %s4780_s16 = int_to_ptr.vmem [resolvable:$false] %s4779_s16 }
  0x23   : > { %s4781_s17 = scalar_lea.vmem %s4780_s16, 1024  ;;  %p4782_p12 = scmp.lt.s32.totalorder %s324_s23, %s4780_s16 }
  0x24   : > { %p4777_p10 = pnand %p4775_p9, %p6239_p8  ;;  %p4783_p13 = scmp.lt.s32.totalorder %s4781_s17, %s4774_s12 }
  0x25   : > { %s322_s1 = scalar_lea.hbm %s6255_s3, %s4100_s5 }
  0x26   : > { %p4778_p11 = pneg %p4777_p10  ;;  %p4784_p0 = por %p4783_p13, %p4782_p12 }
  0x28   : > { %p4785_p1 = pnand %p4784_p0, %p4778_p11 }
  0x2a   : > { %4788 = shalt.err (!%p4785_p1)
}
  0x2b   : > { %s6241_s5 = smov 128   ;;  %s6242_s7 = smov 8  }
  0x2c   : > { %4618 = dma.hbm_to_vmem [thread:$0]  (!%p5058_p6), %s322_s1, 512, %s324_s23, %s5074_s0, %s6241_s5, %s6241_s5, %s6242_s7  }
  0x2d   : > { %s6240_s27 = sadd.s32 4294967295, %s4945_s8   ;;  %p110_p2 = scmp.ne.s32.totalorder %s4921_s25, %s4917_s24 }
  0x2e   : > { %p5092_p3 = scmp.eq.s32.totalorder %s6240_s27, 0  ;;  %p4093_p4 = scmp.ge.s32.totalorder %s4945_s8, 1 }
  0x2f   : > { %p245_p5 = scmp.lt.s32.totalorder %s4945_s8, 5  ;;  %s4950_s1 = smov [#allocation7]  }
  0x30   : > { %p5100_p7 = por %p5092_p3, %p110_p2  ;;  %s261_s24 = sshll.u32 %s4950_s1, 4  ;;  %s262_s24 = int_to_ptr.vmem [resolvable:$true] %s261_s24 }
  0x31   : > { %p5104_p9 = pnand %p4093_p4, %p245_p5  ;;  %s4594_s19 = smul.u32 768, %s5054_s13 }
  0x32   : > { %s4595_s21 = smul.u32 96, %s4937_s29  ;;  %s4800_s16 = scalar_lea.vmem %s262_s24, 32 }
  0x33   : > { %p4608_p10 = pneg %p5104_p9  ;;  %s4596_s23 = smul.u32 192, %s4941_s30 }
  0x34   : > { %s291_s12 = scalar_lea.vmem [#allocation2], %s4594_s19  ;;  %p4801_p13 = scmp.ne.s32.totalorder %s262_s24, %s4800_s16 }
  0x35   : > { %p5114_p11 = pnand %p4608_p10, %p5092_p3  ;;  %s300_s11 = sshll.u32 %s291_s12, 4  ;;  %s5119_s11 = int_to_ptr.vmem [resolvable:$true] %s300_s11 }
  0x36   : > { %p4808_p2 = scmp.lt.s32.totalorder %s262_s24, %s262_s24  ;;  %p4809_p4 = scmp.lt.s32.totalorder %s4800_s16, %s4800_s16 }
  0x37   : > { %p4791_p12 = pneg %p5114_p11 }
  0x38   : > { %p4810_p5 = por %p4809_p4, %p4808_p2 }
  0x39   : > { %p4803_p0 = pnand %p4801_p13, %p4791_p12 }
  0x3b   : > { %p4804_p1 = pneg %p4803_p0 }
  0x3d   : > { %p4811_p8 = pnand %p4810_p5, %p4804_p1 }
  0x3f   : > { %4814 = shalt.err (!%p4811_p8)
}
  0x40   : > { %s6260_s6 = sld [smem:[#allocation20_spill]]  ;;  %s297_s19 = sadd.s32 %s4596_s23, %s4595_s21 }
  0x41   : > { %s4096_s12 = sshll.u32 %s297_s19, 7  ;;  %s4101_s27 = sshll.u32 %s5054_s13, 4 }
  0x42   : > { %s6261_s2 = sld [smem:[#allocation17_spill]]  ;;  %s288_s3 = scalar_lea.sflag [#allocation3], %s5054_s13 }
  0x43   : > { %s4828_s10 = scalar_lea.vmem %s5119_s11, 12288  ;;  %p6262_p10 = pneg %p5058_p6 }
  0x44   : > { %p4829_p8 = scmp.ne.s32.totalorder %s5119_s11, %s4828_s10  ;;  %s4951_s22 = smov [#allocation2]  }
  0x45   : > { %s4833_s17 = sshll.u32 %s4951_s22, 4  ;;  %s4834_s17 = int_to_ptr.vmem [resolvable:$false] %s4833_s17 }
  0x46   : > { %4611 = dma.hbm_to_vmem [thread:$0]  (!%p5114_p11), %s6260_s6, 32, %s262_s24, [#allocation8]  }
  0x47   : > { %p4831_p12 = pnand %p4829_p8, %p6262_p10  ;;  %s4835_s1 = scalar_lea.vmem %s4834_s17, 24576 }
  0x48   : > { %s299_s7 = scalar_lea.hbm %s6261_s2, %s4096_s12  ;;  %p4836_p0 = scmp.lt.s32.totalorder %s5119_s11, %s4834_s17 }
  0x49   : > { %p4832_p13 = pneg %p4831_p12  ;;  %p4837_p11 = scmp.lt.s32.totalorder %s4835_s1, %s4828_s10 }
  0x4b   : > { %p4838_p1 = por %p4837_p11, %p4836_p0 }
  0x4d   : > { %p4839_p2 = pnand %p4838_p1, %p4832_p13 }
  0x4f   : > { %4842 = shalt.err (!%p4839_p2)
}
  0x50   : > { %s4952_s24 = smov 768   ;;  %s4953_s13 = smov 48  }
  0x51   : > { %4615 = dma.hbm_to_vmem [thread:$0]  (!%p5058_p6), %s299_s7, 12288, %s5119_s11, %s288_s3, %s4952_s24, %s4952_s24, %s4953_s13  }
  0x52   : > { %s4102_s5 = sshll.u32 %s4937_s29, 1  ;;  %s4103_s21 = sshll.u32 %s4941_s30, 2 }
  0x53   : > { %s343_s23 = sadd.s32 %s4103_s21, %s4102_s5  ;;  %s337_s19 = scalar_lea.vmem [#allocation6], %s4101_s27 }
  0x54   : > { %s346_s12 = sshll.u32 %s337_s19, 4  ;;  %s4104_s16 = sshll.u32 %s343_s23, 7  ;;  %s347_s12 = int_to_ptr.vmem [resolvable:$true] %s346_s12 }
  0x55   : > { %s345_s17 = scalar_lea.hbm %s6233_s4, %s4104_s16  ;;  %s4856_s1 = scalar_lea.vmem %s347_s12, 256 }
  0x56   : > { %p4857_p4 = scmp.ne.s32.totalorder %s347_s12, %s4856_s1  ;;  %p6263_p5 = pmov %p6262_p10 }
  0x57   : > { %s4954_s2 = smov [#allocation6]  }
  0x58   : > { %p4859_p8 = pnand %p4857_p4, %p6263_p5  ;;  %s4861_s6 = sshll.u32 %s4954_s2, 4  ;;  %s4862_s6 = int_to_ptr.vmem [resolvable:$false] %s4861_s6 }
  0x59   : > { %s4863_s3 = scalar_lea.vmem %s4862_s6, 512  ;;  %p4864_p12 = scmp.lt.s32.totalorder %s347_s12, %s4862_s6 }
  0x5a   : > { %p4860_p10 = pneg %p4859_p8  ;;  %p4865_p13 = scmp.lt.s32.totalorder %s4863_s3, %s4856_s1 }
  0x5c   : > { %p4866_p0 = por %p4865_p13, %p4864_p12 }
  0x5e   : > { %p4867_p11 = pnand %p4866_p0, %p4860_p10 }
  0x60   : > { %4870 = shalt.err (!%p4867_p11)
}
  0x61   : > { %s6264_s7 = smov 8   ;;  %s6265_s27 = smov 128  }
  0x62   : > { %4621 = dma.hbm_to_vmem [thread:$0]  (!%p5058_p6), %s345_s17, 256, %s347_s12, %s5074_s0, %s6265_s27, %s6265_s27, %s6264_s7  }
  0x63   : > { %358 = sbr.rel (%p5104_p9) target bundleno = 2117 (0x845), region = 48  ;;  %s360_s2 = sand.u32 (!%p5104_p9), 1, %s4921_s25  }
  0x64   : > { %s4597_s11 = smul.u32 (!%p5104_p9), 768, %s360_s2  ;;  %s361_s24 = scalar_lea.sflag (!%p5104_p9), [#allocation3], %s360_s2 }
  0x66   : > { %s5159_s6 = scalar_lea.vmem (!%p5104_p9), [#allocation2], %s4597_s11 }
  0x68   : > { %4904 = dma.done.wait (%p5100_p7), %s361_s24, 12288  }
  0x69   : > { %4906 = vsyncadd (%p5100_p7), %s361_s24, 4294955008  ;;  %s6266_s14 = sadd.s32 4294967295, %s4945_s8   ;;  %s4106_s0 = sshll.u32 %s360_s2, 5 }
  0x6a   : > { %s369_s13 = sand.u32 1, %s6266_s14   ;;  %s5167_s18 = scalar_lea.vmem [#allocation4], %s4106_s0 }
  0x6b   : > { %s370_s5 = scalar_lea.sflag [#allocation5], %s369_s13 }
  0x6c   : > { %4908 = dma.done.wait (%p5100_p7), %s370_s5, 768  }
  0x6d   : > { %4910 = vsyncadd (%p5100_p7), %s370_s5, 4294966528  ;;  %s4107_s21 = sshll.u32 %s360_s2, 4 }
  0x6e   : > { %s5173_s23 = scalar_lea.vmem [#allocation6], %s4107_s21 }
  0x6f   : > { %4912 = dma.done.wait (%p5092_p3), [#allocation8], 32  }
  0x70   : > { %4914 = vsyncadd (%p5092_p3), [#allocation8], 4294967264  ;;  %p435_p6 = scmp.lt.s32.totalorder %s4933_s28, 1  ;;  %s6267_s22 = sld [smem:[#allocation15_spill]] }
  0x71   : > { %s6268_s3 = sld [smem:[#allocation16_spill]] }
  0x72   : > { %s6292_s28 = smov (!%p435_p6, %s4933_s28), 1  ;;  %s6269_s11 = sld [smem:[#allocation21_spill]] }
  0x73   : > { %s4109_s19 = sshll.u32 %s6292_s28, 1  ;;  %s4132_s12 = sshll.u32 %s6292_s28, 4 }
  0x74   : > { %s6270_s24 = sld [smem:[#allocation12_spill]] }
  0x76   : > { %s438_s15 = scalar_lea.vmem %s6267_s22, %s4109_s19 }
  0x77   : > { %s5187_s7 = scalar_lea.vmem %s6268_s3, %s4132_s12 }
  0x78   : > { %s5192_s9 = scalar_lea.vmem %s6269_s11, %s4109_s19 }
  0x7a   : > { %p4113_p3 = scmp.ne.s32.totalorder %s6270_s24, 0 }
  0x7c   : > { %451 = sbr.rel (%p4113_p3) target bundleno = 131 (0x83), region = 68 }
  0x81   : > { %v452_v0 = vld [vmem:[%s438_s15] sm:$0x3] }
  0x82   : > { %453 = vst [vmem:[%s5192_s9] sm:$0x3] %v452_v0 }
  0x83 PF: > { %v474_v1 = vld [vmem:[%s5159_s6 + $0x2d0] sm:$0xff]  ;;  %v4955_v2 = vmov 0.0   ;;  %v473_v3 = vld [vmem:[%s5159_s6 + $0x2a0] sm:$0xff]  ;;  %vm4956_vm0 = vmmov 0   ;;  %v475_v19 = vlaneseq  ;;  %vm554_vm1 = vcmask 1041408   ;;  %v622_v32 = vld [vmem:[%s5159_s6 + $0x2d8] sm:$0xff] }
  0x84   : > { %4284 = vmatprep.subr.mxu0 %v4955_v2  ;;  %4316 = vmatprep.mubr.msk.f32.mxu0 %vm4956_vm0, %v4955_v2  ;;  %v472_v4 = vld [vmem:[%s5159_s6 + $0x270] sm:$0xff]  ;;  %v471_v5 = vld [vmem:[%s5159_s6 + $0x240] sm:$0xff]  ;;  %v624_v34 = vld [vmem:[%s5159_s6 + $0x2e8] sm:$0xff]  ;;  %s6271_s13 = sld [smem:[#allocation19_spill]]  ;;  %vm2625_vm2 = vcmask 11265   ;;  %vm2032_vm3 = vcmask 1041409  }
  0x85   : > { %4285 = vmatpush3.msra.mxu0 %v474_v1  ;;  %689 = vmatprep.mubr.f32.mxu1 %v4955_v2  ;;  %v470_v6 = vld [vmem:[%s5159_s6 + $0x210] sm:$0xff]  ;;  %v469_v7 = vld [vmem:[%s5159_s6 + $0x1e0] sm:$0xff]  ;;  %v5235_v20 = vshrl.u32 %v475_v19, 7  ;;  %v619_v35 = vld [vmem:[%s5159_s6 + $0x2a8] sm:$0xff]  ;;  %vm2013_vm4 = vcmask 10240   ;;  %vm2695_vm5 = vcmask 1040384  }
  0x86   : > { %4286 = vmatprep.subr.mxu0 %v4955_v2  ;;  %v468_v8 = vld [vmem:[%s5159_s6 + $0x1b0] sm:$0xff]  ;;  %v467_v9 = vld [vmem:[%s5159_s6 + $0x180] sm:$0xff]  ;;  %v621_v37 = vld [vmem:[%s5159_s6 + $0x2b8] sm:$0xff]  ;;  %vm2696_vm6 = vcmask 1042434   ;;  %vm2698_vm7 = vcmask 1044484   ;;  %vm2700_vm8 = vcmask 1046534  }
  0x87   : > { %4287 = vmatpush3.msra.mxu0 %v473_v3  ;;  %v466_v10 = vld [vmem:[%s5159_s6 + $0x150] sm:$0xff]  ;;  %v465_v11 = vld [vmem:[%s5159_s6 + $0x120] sm:$0xff]  ;;  %v5238_v21 = vsub.s32 0, %v5235_v20  ;;  %v551_v23 = vsub.s32 3, %v5235_v20  ;;  %v616_v38 = vld [vmem:[%s5159_s6 + $0x278] sm:$0xff]  ;;  %vm1980_vm11 = vcmask 14336  }
  0x88   : > { %4288 = vmatprep.subr.mxu0 %v4955_v2  ;;  %v464_v12 = vld [vmem:[%s5159_s6 + $0xf0] sm:$0xff]  ;;  %v463_v13 = vld [vmem:[%s5159_s6 + $0xc0] sm:$0xff]  ;;  %v618_v39 = vld [vmem:[%s5159_s6 + $0x288] sm:$0xff]  ;;  %vm2895_vm13 = vcmask 1046528   ;;  %vm2891_vm14 = vcmask 56320   ;;  %vm3109_vm15 = vcmask 1042432  }
  0x89   : > { %4289 = vmatpush3.msra.mxu0 %v472_v4  ;;  %v462_v14 = vld [vmem:[%s5159_s6 + $0x90] sm:$0xff]  ;;  %v461_v15 = vld [vmem:[%s5159_s6 + $0x60] sm:$0xff]  ;;  %v613_v41 = vld [vmem:[%s5159_s6 + $0x248] sm:$0xff] }
  0x8a   : > { %4290 = vmatprep.subr.mxu0 %v4955_v2  ;;  %v460_v16 = vld [vmem:[%s5159_s6 + $0x30] sm:$0xff]  ;;  %v459_v17 = vld [vmem:[%s5159_s6] sm:$0xff]  ;;  %v615_v42 = vld [vmem:[%s5159_s6 + $0x258] sm:$0xff] }
  0x8b   : > { %4291 = vmatpush3.msra.mxu0 %v471_v5  ;;  %v454_v18 = vld [vmem:[%s5192_s9] sm:$0x3]  ;;  %v5253_v33 = vld [vmem:[%s5159_s6 + $0x2b0] sm:$0xff]  ;;  %v610_v44 = vld [vmem:[%s5159_s6 + $0x218] sm:$0xff] }
  0x8c   : > { %4292 = vmatprep.subr.mxu0 %v4955_v2  ;;  %v5241_v22 = vld [vmem:[%s5167_s18] sm:$0xff]  ;;  %v5267_v40 = vld [vmem:[%s5159_s6 + $0x250] sm:$0xff]  ;;  %v612_v45 = vld [vmem:[%s5159_s6 + $0x228] sm:$0xff] }
  0x8d   : > { %4293 = vmatpush3.msra.mxu0 %v470_v6  ;;  %v478_v24 = vrot.slane %v5241_v22, %v5238_v21  ;;  %v552_v25 = vrot.slane %v5241_v22, %v551_v23  ;;  %v5249_v31 = vld [vmem:[%s5159_s6 + $0x2e0] sm:$0xff]  ;;  %v5281_v46 = vld [vmem:[%s5159_s6 + $0x1f0] sm:$0xff]  ;;  %v607_v52 = vld [vmem:[%s5159_s6 + $0x1e8] sm:$0xff] }
  0x8e   : > { %4294 = vmatprep.subr.mxu0 %v4955_v2  ;;  %625 = vmatprep.subr.mxu1 %v5249_v31  ;;  %v5259_v36 = vld [vmem:[%s5159_s6 + $0x280] sm:$0xff]  ;;  %v609_v54 = vld [vmem:[%s5159_s6 + $0x1f8] sm:$0xff]  ;;  %v5301_v56 = vld [vmem:[%s5159_s6 + $0x190] sm:$0xff] }
  0x8f   : > { %4295 = vmatpush3.msra.mxu0 %v469_v7  ;;  %626 = vmatpush1.msra.mxu1 %v622_v32  ;;  %v5274_v43 = vld [vmem:[%s5159_s6 + $0x220] sm:$0xff]  ;;  %v604_v55 = vld [vmem:[%s5159_s6 + $0x1b8] sm:$0xff]  ;;  %v606_v57 = vld [vmem:[%s5159_s6 + $0x1c8] sm:$0xff] }
  0x90   : > { %4296 = vmatprep.subr.mxu0 %v4955_v2  ;;  %627 = vmatprep.subr.mxu1 %v5253_v33  ;;  %v5294_v53 = vld [vmem:[%s5159_s6 + $0x1c0] sm:$0xff]  ;;  %v601_v58 = vld [vmem:[%s5159_s6 + $0x188] sm:$0xff]  ;;  %v603_v60 = vld [vmem:[%s5159_s6 + $0x198] sm:$0xff] }
  0x91   : > { %4297 = vmatpush3.msra.mxu0 %v468_v8  ;;  %628 = vmatpush1.msra.mxu1 %v619_v35  ;;  %v5307_v59 = vld [vmem:[%s5159_s6 + $0x160] sm:$0xff]  ;;  %v598_v61 = vld [vmem:[%s5159_s6 + $0x158] sm:$0xff]  ;;  %v5313_v62 = vld [vmem:[%s5159_s6 + $0x130] sm:$0xff] }
  0x92   : > { %4298 = vmatprep.subr.mxu0 %v4955_v2  ;;  %629 = vmatprep.subr.mxu1 %v5259_v36  ;;  %v600_v63 = vld [vmem:[%s5159_s6 + $0x168] sm:$0xff]  ;;  %v5320_v1 = vld [vmem:[%s5159_s6 + $0x100] sm:$0xff]  ;;  %v597_v3 = vld [vmem:[%s5159_s6 + $0x138] sm:$0xff] }
  0x93   : > { %4299 = vmatpush3.msra.mxu0 %v467_v9  ;;  %630 = vmatpush1.msra.mxu1 %v616_v38  ;;  %v595_v0 = vld [vmem:[%s5159_s6 + $0x128] sm:$0xff]  ;;  %v592_v4 = vld [vmem:[%s5159_s6 + $0xf8] sm:$0xff]  ;;  %v5327_v5 = vld [vmem:[%s5159_s6 + $0xd0] sm:$0xff] }
  0x94   : > { %4300 = vmatprep.subr.mxu0 %v4955_v2  ;;  %631 = vmatprep.subr.mxu1 %v5267_v40  ;;  %v594_v6 = vld [vmem:[%s5159_s6 + $0x108] sm:$0xff]  ;;  %v5334_v8 = vld [vmem:[%s5159_s6 + $0xa0] sm:$0xff]  ;;  %v591_v9 = vld [vmem:[%s5159_s6 + $0xd8] sm:$0xff] }
  0x95   : > { %4301 = vmatpush3.msra.mxu0 %v466_v10  ;;  %632 = vmatpush1.msra.mxu1 %v613_v41  ;;  %v589_v7 = vld [vmem:[%s5159_s6 + $0xc8] sm:$0xff]  ;;  %v586_v10 = vld [vmem:[%s5159_s6 + $0x98] sm:$0xff]  ;;  %vm5750_vm9 = vmor %vm2695_vm5, %vm2696_vm6 }
  0x96   : > { %4302 = vmatprep.subr.mxu0 %v4955_v2  ;;  %633 = vmatprep.subr.mxu1 %v5274_v43  ;;  %v577_v19 = vld [vmem:[%s5159_s6 + $0x8] sm:$0xff]  ;;  %v579_v23 = vld [vmem:[%s5159_s6 + $0x18] sm:$0xff]  ;;  %vm2699_vm10 = vmor %vm5750_vm9, %vm2698_vm7 }
  0x97   : > { %4303 = vmatpush3.msra.mxu0 %v465_v11  ;;  %634 = vmatpush1.msra.mxu1 %v610_v44  ;;  %v5341_v11 = vld [vmem:[%s5159_s6 + $0x70] sm:$0xff]  ;;  %vm5805_vm12 = vmor %vm2699_vm10, %vm2700_vm8 }
  0x98   : > { %4304 = vmatprep.subr.mxu0 %v4955_v2  ;;  %635 = vmatprep.subr.mxu1 %v5281_v46 }
  0x99   : > { %4305 = vmatpush3.msra.mxu0 %v464_v12  ;;  %636 = vmatpush1.msra.mxu1 %v607_v52  ;;  %v588_v12 = vld [vmem:[%s5159_s6 + $0xa8] sm:$0xff] }
  0x9a   : > { %4306 = vmatprep.subr.mxu0 %v4955_v2  ;;  %637 = vmatprep.subr.mxu1 %v5294_v53 }
  0x9b   : > { %4307 = vmatpush3.msra.mxu0 %v463_v13  ;;  %638 = vmatpush1.msra.mxu1 %v604_v55  ;;  %v583_v13 = vld [vmem:[%s5159_s6 + $0x68] sm:$0xff] }
  0x9c   : > { %4308 = vmatprep.subr.mxu0 %v4955_v2  ;;  %639 = vmatprep.subr.mxu1 %v5301_v56 }
  0x9d   : > { %4309 = vmatpush3.msra.mxu0 %v462_v14  ;;  %640 = vmatpush1.msra.mxu1 %v601_v58  ;;  %v5348_v14 = vld [vmem:[%s5159_s6 + $0x40] sm:$0xff] }
  0x9e   : > { %4310 = vmatprep.subr.mxu0 %v4955_v2  ;;  %641 = vmatprep.subr.mxu1 %v5307_v59 }
  0x9f   : > { %4311 = vmatpush3.msra.mxu0 %v461_v15  ;;  %642 = vmatpush1.msra.mxu1 %v598_v61  ;;  %v585_v15 = vld [vmem:[%s5159_s6 + $0x78] sm:$0xff] }
  0xa0   : > { %4312 = vmatprep.subr.mxu0 %v4955_v2  ;;  %643 = vmatprep.subr.mxu1 %v5313_v62 }
  0xa1   : > { %4313 = vmatpush3.msra.mxu0 %v460_v16  ;;  %644 = vmatpush1.msra.mxu1 %v595_v0  ;;  %v580_v16 = vld [vmem:[%s5159_s6 + $0x38] sm:$0xff] }
  0xa2   : > { %4314 = vmatprep.subr.mxu0 %v4955_v2  ;;  %645 = vmatprep.subr.mxu1 %v5320_v1 }
  0xa3   : > { %4315 = vmatpush3.msra.mxu0 %v459_v17  ;;  %646 = vmatpush1.msra.mxu1 %v592_v4  ;;  %v5355_v17 = vld [vmem:[%s5159_s6 + $0x10] sm:$0xff]  ;;  %v574_v4 = vsub.s32 2, %v5235_v20 }
  0xa4   : > { %4317 = vmatmul.mubr.f32.vlgmr.msra.gmra.mxu0 %v454_v18  ;;  %4319 = vmatprep.subr.mxu0 %v4955_v2  ;;  %v582_v18 = vld [vmem:[%s5159_s6 + $0x48] sm:$0xff] }
  0xa5   : > { %4351 = vmatprep.mubr.msk.f32.mxu0 %vm4956_vm0, %v4955_v2  ;;  %4320 = vmatpush3.msra.mxu0 %v624_v34  ;;  %v782_v34 = vld [vmem:[%s5187_s7 + $0x8] sm:$0x7f] }
  0xa6   : > { %4321 = vmatprep.subr.mxu0 %v4955_v2  ;;  %647 = vmatprep.subr.mxu1 %v5327_v5 }
  0xa7   : > { %4322 = vmatpush3.msra.mxu0 %v621_v37  ;;  %648 = vmatpush1.msra.mxu1 %v589_v7 }
  0xa8   : > { %4323 = vmatprep.subr.mxu0 %v4955_v2  ;;  %649 = vmatprep.subr.mxu1 %v5334_v8 }
  0xa9   : > { %4324 = vmatpush3.msra.mxu0 %v618_v39  ;;  %650 = vmatpush1.msra.mxu1 %v586_v10 }
  0xaa   : > { %4325 = vmatprep.subr.mxu0 %v4955_v2  ;;  %651 = vmatprep.subr.mxu1 %v5341_v11 }
  0xab   : > { %4326 = vmatpush3.msra.mxu0 %v615_v42  ;;  %652 = vmatpush1.msra.mxu1 %v583_v13  ;;  %v575_v13 = vrot.slane %v5241_v22, %v574_v4 }
  0xac   : > { %4327 = vmatprep.subr.mxu0 %v4955_v2  ;;  %653 = vmatprep.subr.mxu1 %v5348_v14 }
  0xad   : > { %4328 = vmatpush3.msra.mxu0 %v612_v45  ;;  %654 = vmatpush1.msra.mxu1 %v580_v16 }
  0xae   : > { %4329 = vmatprep.subr.mxu0 %v4955_v2  ;;  %655 = vmatprep.subr.mxu1 %v5355_v17 }
  0xaf   : > { %4330 = vmatpush3.msra.mxu0 %v609_v54  ;;  %656 = vmatpush1.msra.mxu1 %v577_v19  ;;  %v833_v19 = vcombine.high %v782_v34, %v782_v34 }
  0xb0   : > { %4331 = vmatprep.subr.mxu0 %v4955_v2  ;;  %4354 = vmatprep.subr.mxu1 %v5249_v31 }
  0xb1   : > { %4332 = vmatpush3.msra.mxu0 %v606_v57 }
  0xb2   : > { %4333 = vmatprep.subr.mxu0 %v4955_v2 }
  0xb3   : > { %4334 = vmatpush3.msra.mxu0 %v603_v60 }
  0xb4   : > { %4335 = vmatprep.subr.mxu0 %v4955_v2 }
  0xb5   : > { %4336 = vmatpush3.msra.mxu0 %v600_v63  ;;  %v569_v63 = vsub.s32 1, %v5235_v20 }
  0xb6   : > { %4337 = vmatprep.subr.mxu0 %v4955_v2 }
  0xb7   : > { %4338 = vmatpush3.msra.mxu0 %v597_v3 }
  0xb8   : > { %4339 = vmatprep.subr.mxu0 %v4955_v2 }
  0xb9   : > { %4340 = vmatpush3.msra.mxu0 %v594_v6  ;;  %v570_v6 = vrot.slane %v5241_v22, %v569_v63 }
  0xba   : > { %4341 = vmatprep.subr.mxu0 %v4955_v2 }
  0xbb   : > { %4342 = vmatpush3.msra.mxu0 %v591_v9 }
  0xbc   : > { %4343 = vmatprep.subr.mxu0 %v4955_v2 }
  0xbd   : > { %4344 = vmatpush3.msra.mxu0 %v588_v12 }
  0xbe   : > { %4345 = vmatprep.subr.mxu0 %v4955_v2 }
  0xbf   : > { %4346 = vmatpush3.msra.mxu0 %v585_v15 }
  0xc0   : > { %4347 = vmatprep.subr.mxu0 %v4955_v2 }
  0xc1   : > { %4348 = vmatpush3.msra.mxu0 %v582_v18 }
  0xc2   : > { %4349 = vmatprep.subr.mxu0 %v4955_v2 }
  0xc3   : > { %4350 = vmatpush3.msra.mxu0 %v579_v23  ;;  %v5396_v23 = vld [vmem:[%s6271_s13 + $0x78] sm:$0xff] }
  0xc4   : > { %4389 = vmatprep.subr.mxu0 %v4955_v2 }
 0x164   : > { %v545_v26 = vpop.f32.mrf.mxu0 }
 0x165   : > { %v546_v27 = vadd.f32 %v545_v26, %v478_v24  ;;  %v4957_v24 = vmov 1966171168  }
 0x166   : > { %v4318_v28 = vpop.f32.mrf.mxu0 }
 0x167   : > { %v553_v29 = vmul.f32 %v552_v25, %v546_v27 }
 0x169   : > { %v555_v30 = vsel %vm554_vm1, %v553_v29, 0.0 }
 0x16a   : > { %556 = vadd.xlane.f32.xlu0 %v555_v30 }
 0x1f3   : > { %v557_v47 = vpop.xlane.xlu0 %556 }
 0x1f4   : > { %v5287_v48 = vsub.f32 %v546_v27, %v557_v47  ;;  %v781_v27 = vld [vmem:[%s5187_s7] sm:$0x7f] }
 0x1f5   : > { %v785_v29 = vcombine.high %v781_v27, %v781_v27 }
 0x1f6   : > { %v559_v49 = vmul.f32 %v5287_v48, %v5287_v48 }
 0x1f8   : > { %v560_v50 = vmul.f32 %v559_v49, %v552_v25  ;;  %v787_v25 = vunpack.c.l.s4 %v4957_v24 }
 0x1fa   : > { %v561_v51 = vsel %vm554_vm1, %v560_v50, 0.0  ;;  %v788_v26 = vunpack.c.0.s8 %v787_v25 }
 0x1fb   : > { %562 = vadd.xlane.f32.xlu0 %v561_v51 }
 0x1fc   : > { %v5368_v28 = vsub.s32 %v788_v26, %v5235_v20 }
 0x1fe   : > { %v792_v30 = vrot.slane %v781_v27, %v5368_v28  ;;  %v799_v32 = vrot.slane %v785_v29, %v5368_v28  ;;  %v840_v39 = vrot.slane %v782_v34, %v5368_v28  ;;  %v847_v25 = vrot.slane %v833_v19, %v5368_v28 }
 0x200   : > { %v800_v35 = vcombine.high %v792_v30, %v792_v30  ;;  %v801_v37 = vcombine.high %v799_v32, %v799_v32  ;;  %v815_v38 = vrot.slane %v799_v32, %v5368_v28  ;;  %v5376_v41 = vrot.slane %v840_v39, %v5368_v28 }
 0x201   : > { %v808_v44 = vrot.slane %v792_v30, %v5368_v28  ;;  %v848_v24 = vcombine.high %v840_v39, %v840_v39  ;;  %v849_v27 = vcombine.high %v847_v25, %v847_v25  ;;  %v863_v30 = vrot.slane %v847_v25, %v5368_v28  ;;  %v5471_v39 = vld [vmem:[%s6271_s13 + $0x38] sm:$0xff] }
 0x202   : > { %v822_v45 = vrot.slane %v800_v35, %v5368_v28  ;;  %v829_v47 = vrot.slane %v801_v37, %v5368_v28  ;;  %v831_v49 = vcombine.high %v815_v38, %v815_v38  ;;  %v878_v29 = vcombine.high %v5376_v41, %v5376_v41 }
 0x203   : > { %v870_v26 = vrot.slane %v848_v24, %v5368_v28  ;;  %v877_v34 = vrot.slane %v849_v27, %v5368_v28  ;;  %v879_v35 = vcombine.high %v863_v30, %v863_v30 }
 0x204   : > { %v897_v51 = vcombine.low %v808_v44, %v822_v45  ;;  %v4114_v52 = vcombine.high %v808_v44, %v822_v45  ;;  %v899_v54 = vcombine.low %v815_v38, %v829_v47  ;;  %v900_v55 = vcombine.low %v831_v49, %v5376_v41  ;;  %v5491_v44 = vld [vmem:[%s6271_s13 + $0x28] sm:$0xff]  ;;  %v5510_v47 = vld [vmem:[%s6271_s13 + $0x18] sm:$0xff] }
 0x205   : > { %v880_v32 = vcombine.high %v870_v26, %v870_v26  ;;  %v946_v37 = vcombine.low %v870_v26, %v878_v29 }
 0x206   : > { %v907_v57 = vrot.slane %v897_v51, %v5368_v28  ;;  %v914_v58 = vrot.slane %v4114_v52, %v5368_v28  ;;  %v921_v60 = vrot.slane %v899_v54, %v5368_v28  ;;  %v928_v61 = vrot.slane %v900_v55, %v5368_v28 }
 0x207   : > { %v947_v38 = vcombine.low %v880_v32, %v863_v30  ;;  %v955_v41 = vrot.slane %v946_v37, %v5368_v28  ;;  %v4958_v52 = vmov 1983009808  }
 0x208   : > { %v929_v0 = vcombine.low %v907_v57, %v914_v58  ;;  %v930_v3 = vcombine.low %v921_v60, %v928_v61  ;;  %v1717_v54 = vunpack.c.l.s4 %v4958_v52 }
 0x20a   : > { %v937_v9 = vrot.slane %v929_v0, %v5368_v28  ;;  %v944_v10 = vrot.slane %v930_v3, %v5368_v28  ;;  %v1718_v0 = vunpack.c.0.s8 %v1717_v54 }
 0x20c   : > { %v945_v16 = vcombine.low %v937_v9, %v944_v10  ;;  %v457_v10 = vld [vmem:[%s5167_s18 + $0x10] sm:$0xff] }
 0x284   : > { %v563_v42 = vpop.xlane.xlu0 %562 }
 0x285   : > { %v564_v50 = vadd.f32 1e-05, %v563_v42  ;;  %v962_v42 = vrot.slane %v947_v38, %v5368_v28 }
 0x287   : > { %4705 = vrsqrt.f32 %v564_v50  ;;  %v970_v45 = vcombine.low %v955_v41, %v962_v42  ;;  %v773_v50 = vsub.s32 5, %v5235_v20 }
 0x289   : > { %v5586_v55 = vrot.slane %v5241_v22, %v773_v50 }
 0x294   : > { %v4706_v7 = vpop.eup %4705 }
 0x295   : > { %v566_v12 = vmul.f32 %v4706_v7, %v5287_v48  ;;  %v5402_v48 = vld [vmem:[%s6271_s13 + $0x70] sm:$0xff] }
 0x297   : > { %v571_v15 = vmul.f32 %v570_v6, %v566_v12  ;;  %v5595_v12 = vsub.s32 %v1718_v0, %v5235_v20 }
 0x299   : > { %v576_v18 = vadd.f32 %v575_v13, %v571_v15 }
 0x29b   : > { %690 = vmatmul.mubr.f32.vlgmr.msra.gmra.mxu1 %v576_v18  ;;  %4352 = vmatmul.mubr.f32.vlgmr.msra.gmra.mxu0 %v576_v18 }
 0x29c   : > { %4355 = vmatpush3.msra.mxu1 %v5249_v31  ;;  %4386 = vmatprep.mubr.f32.mxu1 %v945_v16  ;;  %v5412_v31 = vld [vmem:[%s6271_s13 + $0x68] sm:$0xff] }
 0x29d   : > { %4356 = vmatprep.subr.mxu1 %v5253_v33  ;;  %4390 = vmatpush3.msra.mxu0 %v5396_v23 }
 0x29e   : > { %4357 = vmatpush3.msra.mxu1 %v5253_v33  ;;  %4391 = vmatprep.subr.mxu0 %v4955_v2  ;;  %v5422_v33 = vld [vmem:[%s6271_s13 + $0x60] sm:$0xff] }
 0x29f   : > { %4358 = vmatprep.subr.mxu1 %v5259_v36  ;;  %4392 = vmatpush3.msra.mxu0 %v5402_v48 }
 0x2a0   : > { %4359 = vmatpush3.msra.mxu1 %v5259_v36  ;;  %4393 = vmatprep.subr.mxu0 %v4955_v2  ;;  %v5431_v36 = vld [vmem:[%s6271_s13 + $0x58] sm:$0xff] }
 0x2a1   : > { %4360 = vmatprep.subr.mxu1 %v5267_v40  ;;  %4394 = vmatpush3.msra.mxu0 %v5412_v31 }
 0x2a2   : > { %4361 = vmatpush3.msra.mxu1 %v5267_v40  ;;  %4395 = vmatprep.subr.mxu0 %v4955_v2  ;;  %v5443_v40 = vld [vmem:[%s6271_s13 + $0x50] sm:$0xff] }
 0x2a3   : > { %4362 = vmatprep.subr.mxu1 %v5274_v43  ;;  %4396 = vmatpush3.msra.mxu0 %v5422_v33 }
 0x2a4   : > { %4363 = vmatpush3.msra.mxu1 %v5274_v43  ;;  %4397 = vmatprep.subr.mxu0 %v4955_v2  ;;  %v5453_v43 = vld [vmem:[%s6271_s13 + $0x48] sm:$0xff] }
 0x2a5   : > { %4364 = vmatprep.subr.mxu1 %v5281_v46  ;;  %4398 = vmatpush3.msra.mxu0 %v5431_v36 }
 0x2a6   : > { %4365 = vmatpush3.msra.mxu1 %v5281_v46  ;;  %4399 = vmatprep.subr.mxu0 %v4955_v2  ;;  %v5462_v46 = vld [vmem:[%s6271_s13 + $0x40] sm:$0xff] }
 0x2a7   : > { %4366 = vmatprep.subr.mxu1 %v5294_v53  ;;  %4400 = vmatpush3.msra.mxu0 %v5443_v40 }
 0x2a8   : > { %4367 = vmatpush3.msra.mxu1 %v5294_v53  ;;  %4401 = vmatprep.subr.mxu0 %v4955_v2  ;;  %v948_v53 = vcombine.low %v877_v34, %v879_v35 }
 0x2a9   : > { %4368 = vmatprep.subr.mxu1 %v5301_v56  ;;  %4402 = vmatpush3.msra.mxu0 %v5453_v43 }
 0x2aa   : > { %4369 = vmatpush3.msra.mxu1 %v5301_v56  ;;  %4403 = vmatprep.subr.mxu0 %v4955_v2  ;;  %v5482_v56 = vld [vmem:[%s6271_s13 + $0x30] sm:$0xff] }
 0x2ab   : > { %4370 = vmatprep.subr.mxu1 %v5307_v59  ;;  %4404 = vmatpush3.msra.mxu0 %v5462_v46 }
 0x2ac   : > { %4371 = vmatpush3.msra.mxu1 %v5307_v59  ;;  %4405 = vmatprep.subr.mxu0 %v4955_v2  ;;  %v969_v59 = vrot.slane %v948_v53, %v5368_v28 }
 0x2ad   : > { %4372 = vmatprep.subr.mxu1 %v5313_v62  ;;  %4406 = vmatpush3.msra.mxu0 %v5471_v39 }
 0x2ae   : > { %4373 = vmatpush3.msra.mxu1 %v5313_v62  ;;  %4407 = vmatprep.subr.mxu0 %v4955_v2  ;;  %v5501_v62 = vld [vmem:[%s6271_s13 + $0x20] sm:$0xff]  ;;  %v984_v49 = vrot.slane %v969_v59, %v5368_v28 }
 0x2af   : > { %4374 = vmatprep.subr.mxu1 %v5320_v1  ;;  %4408 = vmatpush3.msra.mxu0 %v5482_v56 }
 0x2b0   : > { %4375 = vmatpush3.msra.mxu1 %v5320_v1  ;;  %4409 = vmatprep.subr.mxu0 %v4955_v2  ;;  %v977_v1 = vrot.slane %v970_v45, %v5368_v28 }
 0x2b1   : > { %4376 = vmatprep.subr.mxu1 %v5327_v5  ;;  %4410 = vmatpush3.msra.mxu0 %v5491_v44 }
 0x2b2   : > { %4377 = vmatpush3.msra.mxu1 %v5327_v5  ;;  %4411 = vmatprep.subr.mxu0 %v4955_v2  ;;  %v985_v5 = vcombine.low %v977_v1, %v984_v49 }
 0x2b3   : > { %4378 = vmatprep.subr.mxu1 %v5334_v8  ;;  %4412 = vmatpush3.msra.mxu0 %v5501_v62 }
 0x2b4   : > { %4379 = vmatpush3.msra.mxu1 %v5334_v8  ;;  %4413 = vmatprep.subr.mxu0 %v4955_v2  ;;  %v5557_v8 = vld [vmem:[%s6271_s13 + $0x10] sm:$0xff] }
 0x2b5   : > { %4380 = vmatprep.subr.mxu1 %v5341_v11  ;;  %4414 = vmatpush3.msra.mxu0 %v5510_v47 }
 0x2b6   : > { %4381 = vmatpush3.msra.mxu1 %v5341_v11  ;;  %4415 = vmatprep.subr.mxu0 %v4955_v2  ;;  %v5565_v11 = vld [vmem:[%s6271_s13 + $0x8] sm:$0xff] }
 0x2b7   : > { %4382 = vmatprep.subr.mxu1 %v5348_v14  ;;  %4421 = vmatprep.mubr.msk.f32.mxu0 %vm4956_vm0, %v4955_v2 }
 0x2b8   : > { %4383 = vmatpush3.msra.mxu1 %v5348_v14  ;;  %4416 = vmatpush3.msra.mxu0 %v5557_v8  ;;  %v5574_v14 = vld [vmem:[%s6271_s13] sm:$0xff] }
 0x2b9   : > { %4384 = vmatprep.subr.mxu1 %v5355_v17  ;;  %4417 = vmatprep.subr.mxu0 %v4955_v2 }
 0x2ba   : > { %4385 = vmatpush3.msra.mxu1 %v5355_v17  ;;  %4418 = vmatpush3.msra.mxu0 %v5565_v11  ;;  %v768_v17 = vsub.s32 4, %v5235_v20 }
 0x2bb   : > { %4387 = vmatmul.mubr.f32.vlgmr.msra.gmra.mxu1 %v985_v5  ;;  %4424 = vmatprep.subr.mxu1 %v5396_v23 }
 0x2bc   : > { %4425 = vmatpush3.msra.mxu1 %v5396_v23  ;;  %4419 = vmatprep.subr.mxu0 %v4955_v2  ;;  %v769_v51 = vrot.slane %v5241_v22, %v768_v17 }
 0x2bd   : > { %4426 = vmatprep.subr.mxu1 %v5402_v48  ;;  %4420 = vmatpush3.msra.mxu0 %v5574_v14 }
 0x2be   : > { %4427 = vmatpush3.msra.mxu1 %v5402_v48  ;;  %4459 = vmatprep.subr.mxu0 %v5396_v23 }
 0x2bf   : > { %4428 = vmatprep.subr.mxu1 %v5412_v31 }
 0x2c0   : > { %4429 = vmatpush3.msra.mxu1 %v5412_v31 }
 0x2c1   : > { %4430 = vmatprep.subr.mxu1 %v5422_v33 }
 0x2c2   : > { %4431 = vmatpush3.msra.mxu1 %v5422_v33 }
 0x2c3   : > { %4432 = vmatprep.subr.mxu1 %v5431_v36 }
 0x2c4   : > { %4433 = vmatpush3.msra.mxu1 %v5431_v36 }
 0x2c5   : > { %4434 = vmatprep.subr.mxu1 %v5443_v40 }
 0x2c6   : > { %4435 = vmatpush3.msra.mxu1 %v5443_v40 }
 0x2c7   : > { %4436 = vmatprep.subr.mxu1 %v5453_v43 }
 0x2c8   : > { %4437 = vmatpush3.msra.mxu1 %v5453_v43 }
 0x2c9   : > { %4438 = vmatprep.subr.mxu1 %v5462_v46 }
 0x2ca   : > { %4439 = vmatpush3.msra.mxu1 %v5462_v46 }
 0x2cb   : > { %4440 = vmatprep.subr.mxu1 %v5471_v39 }
 0x2cc   : > { %4441 = vmatpush3.msra.mxu1 %v5471_v39 }
 0x2cd   : > { %4442 = vmatprep.subr.mxu1 %v5482_v56 }
 0x2ce   : > { %4443 = vmatpush3.msra.mxu1 %v5482_v56 }
 0x2cf   : > { %4444 = vmatprep.subr.mxu1 %v5491_v44 }
 0x2d0   : > { %4445 = vmatpush3.msra.mxu1 %v5491_v44 }
 0x2d1   : > { %4446 = vmatprep.subr.mxu1 %v5501_v62 }
 0x2d2   : > { %4447 = vmatpush3.msra.mxu1 %v5501_v62 }
 0x2d3   : > { %4448 = vmatprep.subr.mxu1 %v5510_v47 }
 0x2d4   : > { %4449 = vmatpush3.msra.mxu1 %v5510_v47 }
 0x2d5   : > { %4450 = vmatprep.subr.mxu1 %v5557_v8 }
 0x2d6   : > { %4451 = vmatpush3.msra.mxu1 %v5557_v8 }
 0x2d7   : > { %4452 = vmatprep.subr.mxu1 %v5565_v11 }
 0x2d8   : > { %4453 = vmatpush3.msra.mxu1 %v5565_v11 }
 0x2d9   : > { %4454 = vmatprep.subr.mxu1 %v5574_v14 }
 0x2da   : > { %4455 = vmatpush3.msra.mxu1 %v5574_v14 }
 0x2db   : > { %4494 = vmatprep.subr.mxu1 %v4955_v2 }
 0x35b   : > { %v691_v57 = vpop.f32.mrf.mxu1  ;;  %v5588_v58 = vpop.f32.mrf.mxu0 }
 0x35c   : > { %v770_v60 = vadd.f32 %v769_v51, %v691_v57 }
 0x35d   : > { %v693_v61 = vpop.f32.mrf.mxu1  ;;  %v4353_v63 = vpop.f32.mrf.mxu0 }
 0x35e   : > { %v1269_v3 = vrot.slane %v770_v60, %v5368_v28  ;;  %v775_v4 = vadd.f32 %v5586_v55, %v693_v61 }
 0x360   : > { %v1270_v6 = vcombine.high %v1269_v3, %v1269_v3  ;;  %v1277_v7 = vrot.slane %v1269_v3, %v5368_v28  ;;  %v1191_v9 = vmul.f32 %v775_v4, %v770_v60 }
 0x362   : > { %v1284_v22 = vrot.slane %v1270_v6, %v5368_v28  ;;  %v1288_v13 = vrot.slane %v1277_v7, %v5238_v21  ;;  %4422 = vmatmul.mubr.f32.vlgmr.msra.gmra.mxu0 %v1191_v9 }
 0x363   : > { %4460 = vmatpush3.msra.mxu0 %v5396_v23 }
 0x364   : > { %v1292_v15 = vrot.slane %v1284_v22, %v5238_v21  ;;  %v1711_v16 = vmul.f32 %v1288_v13, %v457_v10  ;;  %4461 = vmatprep.subr.mxu0 %v5402_v48  ;;  %v1300_v34 = vrot.slane %v1288_v13, %v5368_v28 }
 0x365   : > { %4462 = vmatpush3.msra.mxu0 %v5402_v48 }
 0x366   : > { %4463 = vmatprep.subr.mxu0 %v5412_v31  ;;  %v1712_v18 = vmul.f32 %v1292_v15, %v457_v10  ;;  %v1715_v19 = vcombine.high %v1711_v16, %v1711_v16  ;;  %v1722_v24 = vrot.slane %v1711_v16, %v5595_v12  ;;  %v1341_v32 = vcombine.high %v1292_v15, %v1292_v15 }
 0x367   : > { %4464 = vmatpush3.msra.mxu0 %v5412_v31  ;;  %v1308_v41 = vcombine.high %v1300_v34, %v1300_v34  ;;  %v1316_v49 = vrot.slane %v1300_v34, %v5368_v28 }
 0x368   : > { %4465 = vmatprep.subr.mxu0 %v5422_v33  ;;  %v1729_v25 = vrot.slane %v1715_v19, %v5595_v12  ;;  %v1730_v23 = vcombine.high %v1722_v24, %v1722_v24  ;;  %v1738_v26 = vrot.slane %v1712_v18, %v5595_v12  ;;  %v1355_v38 = vrot.slane %v1341_v32, %v5368_v28 }
 0x369   : > { %4466 = vmatpush3.msra.mxu0 %v5422_v33  ;;  %v1293_v33 = vcombine.high %v1288_v13, %v1288_v13  ;;  %v1330_v52 = vrot.slane %v1308_v41, %v5368_v28  ;;  %v1338_v9 = vcombine.high %v1316_v49, %v1316_v49 }
 0x36a   : > { %4467 = vmatprep.subr.mxu0 %v5431_v36  ;;  %v1747_v48 = vcombine.low %v1722_v24, %v1730_v23  ;;  %v1748_v27 = vcombine.low %v1729_v25, %v1738_v26  ;;  %v1746_v37 = vcombine.high %v1738_v26, %v1738_v26  ;;  %v1357_v59 = vcombine.high %v1355_v38, %v1355_v38 }
 0x36b   : > { %4468 = vmatpush3.msra.mxu0 %v5431_v36  ;;  %v1731_v36 = vcombine.high %v1712_v18, %v1712_v18  ;;  %v1371_v45 = vrot.slane %v1355_v38, %v5368_v28  ;;  %v1340_v24 = vcombine.high %v1330_v52, %v1330_v52 }
 0x36c   : > { %4469 = vmatprep.subr.mxu0 %v5443_v40  ;;  %v1755_v29 = vrot.slane %v1747_v48, %v5595_v12  ;;  %v1762_v31 = vrot.slane %v1748_v27, %v5595_v12  ;;  %v1385_v63 = vrot.slane %v1357_v59, %v5368_v28 }
 0x36d   : > { %4470 = vmatpush3.msra.mxu0 %v5443_v40  ;;  %v1348_v40 = vrot.slane %v1292_v15, %v5368_v28  ;;  %v1745_v35 = vrot.slane %v1731_v36, %v5595_v12  ;;  %v1387_v0 = vcombine.high %v1371_v45, %v1371_v45 }
 0x36e   : > { %4471 = vmatprep.subr.mxu0 %v5453_v43  ;;  %v1763_v30 = vcombine.low %v1755_v29, %v1762_v31 }
 0x36f   : > { %4472 = vmatpush3.msra.mxu0 %v5453_v43  ;;  %v1307_v43 = vrot.slane %v1293_v33, %v5368_v28  ;;  %v5635_v53 = vrot.slane %v1348_v40, %v5368_v28 }
 0x370   : > { %4473 = vmatprep.subr.mxu0 %v5462_v46  ;;  %4491 = vmatprep.mubr.f32.mxu0 %v1763_v30 }
 0x371   : > { %4474 = vmatpush3.msra.mxu0 %v5462_v46  ;;  %v1356_v46 = vcombine.high %v1348_v40, %v1348_v40  ;;  %v1309_v42 = vcombine.high %v1307_v43, %v1307_v43  ;;  %v1323_v50 = vrot.slane %v1307_v43, %v5368_v28  ;;  %v1386_v51 = vcombine.high %v5635_v53, %v5635_v53 }
 0x372   : > { %4475 = vmatprep.subr.mxu0 %v5471_v39 }
 0x373   : > { %4476 = vmatpush3.msra.mxu0 %v5471_v39  ;;  %v1337_v54 = vrot.slane %v1309_v42, %v5368_v28  ;;  %v1339_v15 = vcombine.high %v1323_v50, %v1323_v50 }
 0x374   : > { %4477 = vmatprep.subr.mxu0 %v5482_v56 }
 0x375   : > { %4478 = vmatpush3.msra.mxu0 %v5482_v56  ;;  %v1764_v56 = vcombine.low %v1746_v37, %v1745_v35 }
 0x376   : > { %4479 = vmatprep.subr.mxu0 %v5491_v44 }
 0x377   : > { %4480 = vmatpush3.msra.mxu0 %v5491_v44 }
 0x378   : > { %4481 = vmatprep.subr.mxu0 %v5501_v62 }
 0x379   : > { %4482 = vmatpush3.msra.mxu0 %v5501_v62  ;;  %v1378_v62 = vrot.slane %v1356_v46, %v5368_v28 }
 0x37a   : > { %4483 = vmatprep.subr.mxu0 %v5510_v47 }
 0x37b   : > { %v4388_v39 = vpop.f32.mrf.mxu1  ;;  %4484 = vmatpush3.msra.mxu0 %v5510_v47  ;;  %v1388_v3 = vcombine.high %v1378_v62, %v1378_v62 }
 0x37c   : > { %v1060_v44 = vadd.f32 %v4388_v39, %v5586_v55  ;;  %4485 = vmatprep.subr.mxu0 %v5557_v8 }
 0x37d   : > { %v1054_v1 = vpop.f32.mrf.mxu1  ;;  %4486 = vmatpush3.msra.mxu0 %v5557_v8  ;;  %v1771_v8 = vrot.slane %v1764_v56, %v5595_v12 }
 0x37e   : > { %v1114_v5 = vcombine.high %v1060_v44, %v1060_v44  ;;  %v1121_v47 = vrot.slane %v1060_v44, %v5368_v28  ;;  %v1055_v17 = vadd.f32 %v1054_v1, %v5586_v55  ;;  %4487 = vmatprep.subr.mxu0 %v5565_v11 }
 0x37f   : > { %4488 = vmatpush3.msra.mxu0 %v5565_v11 }
 0x380   : > { %v1128_v57 = vrot.slane %v1114_v5, %v5368_v28  ;;  %v1129_v60 = vcombine.high %v1121_v47, %v1121_v47  ;;  %v1137_v55 = vrot.slane %v1121_v47, %v5368_v28  ;;  %v1065_v61 = vcombine.high %v1055_v17, %v1055_v17  ;;  %4489 = vmatprep.subr.mxu0 %v5574_v14 }
 0x381   : > { %v1072_v4 = vrot.slane %v1055_v17, %v5368_v28  ;;  %4490 = vmatpush3.msra.mxu0 %v5574_v14 }
 0x382   : > { %v1130_v6 = vcombine.high %v1128_v57, %v1128_v57  ;;  %v1151_v11 = vrot.slane %v1129_v60, %v5368_v28  ;;  %v1159_v7 = vcombine.high %v1137_v55, %v1137_v55  ;;  %4492 = vmatmul.mubr.f32.vlgmr.msra.gmra.mxu0 %v1771_v8  ;;  %v1079_v10 = vrot.slane %v1065_v61, %v5368_v28 }
 0x383   : > { %v1080_v22 = vcombine.high %v1072_v4, %v1072_v4  ;;  %v1088_v13 = vrot.slane %v1072_v4, %v5368_v28  ;;  %4559 = vmatprep.subr.mxu0 %v4955_v2  ;;  %4591 = vmatprep.mubr.msk.f32.mxu0 %vm4956_vm0, %v4955_v2  ;;  %v1144_v14 = vrot.slane %v1128_v57, %v5368_v28  ;;  %v4959_v4 = vmov 4  }
 0x384   : > { %v1158_v16 = vrot.slane %v1130_v6, %v5368_v28  ;;  %v1160_v18 = vcombine.high %v1151_v11, %v1151_v11  ;;  %v1412_v19 = vmul.f32 %v1386_v51, %v1151_v11  ;;  %v1081_v25 = vcombine.high %v1079_v10, %v1079_v10  ;;  %4700 = vset.pattern.permute.xlu1 %v4959_v4  ;;  %v5686_v6 = vld [vmem:[%s5173_s23 + $0x8] sm:$0xff] }
 0x385   : > { %v1095_v23 = vrot.slane %v1079_v10, %v5368_v28  ;;  %v1102_v26 = vrot.slane %v1080_v22, %v5368_v28  ;;  %v1411_v48 = vmul.f32 %v1378_v62, %v1137_v55  ;;  %v1413_v27 = vmul.f32 %v1388_v3, %v1159_v7  ;;  %3298 = vperm.xlu1 %4700, %v5686_v6  }
 0x386   : > { %v1414_v29 = vmul.f32 %v1371_v45, %v1160_v18  ;;  %v1110_v31 = vcombine.high %v1088_v13, %v1088_v13  ;;  %v1416_v30 = vmul.f32 %v1387_v0, %v1158_v16  ;;  %v1109_v33 = vrot.slane %v1081_v25, %v5368_v28 }
 0x387   : > { %v1111_v36 = vcombine.high %v1095_v23, %v1095_v23  ;;  %v1112_v32 = vcombine.high %v1102_v26, %v1102_v26  ;;  %v1480_v40 = vcombine.low %v1411_v48, %v1412_v19  ;;  %v1403_v43 = vmul.f32 %v1316_v49, %v1088_v13 }
 0x388   : > { %v1481_v34 = vcombine.low %v1413_v27, %v1414_v29  ;;  %v1404_v35 = vmul.f32 %v1330_v52, %v1102_v26  ;;  %v1415_v37 = vmul.f32 %v1385_v63, %v1144_v14  ;;  %v1113_v38 = vcombine.high %v1109_v33, %v1109_v33 }
 0x389   : > { %v1405_v46 = vmul.f32 %v1338_v9, %v1110_v31  ;;  %v1406_v39 = vmul.f32 %v1340_v24, %v1112_v32  ;;  %v1407_v42 = vmul.f32 %v1323_v50, %v1095_v23  ;;  %v1408_v56 = vmul.f32 %v1337_v54, %v1109_v33 }
 0x38a   : > { %v1496_v41 = vrot.slane %v1481_v34, %v5368_v28  ;;  %v1431_v44 = vcombine.low %v1403_v43, %v1404_v35  ;;  %v1409_v59 = vmul.f32 %v1339_v15, %v1111_v36  ;;  %v1410_v45 = vmul.f32 %v5635_v53, %v1113_v38 }
 0x38b   : > { %v1432_v62 = vcombine.low %v1405_v46, %v1406_v39  ;;  %v1482_v1 = vcombine.low %v1415_v37, %v1416_v30  ;;  %v1489_v5 = vrot.slane %v1480_v40, %v5368_v28  ;;  %v1433_v47 = vcombine.low %v1407_v42, %v1408_v56 }
 0x38c   : > { %v1434_v17 = vcombine.low %v1409_v59, %v1410_v45  ;;  %v1441_v49 = vrot.slane %v1431_v44, %v5368_v28 }
 0x38d   : > { %v1448_v51 = vrot.slane %v1432_v62, %v5368_v28  ;;  %v1504_v52 = vcombine.low %v1489_v5, %v1496_v41  ;;  %v1455_v8 = vrot.slane %v1433_v47, %v5368_v28  ;;  %v1503_v57 = vrot.slane %v1482_v1, %v5368_v28 }
 0x38e   : > { %v1462_v50 = vrot.slane %v1434_v17, %v5368_v28 }
 0x38f   : > { %v1463_v54 = vcombine.low %v1441_v49, %v1448_v51  ;;  %v1511_v60 = vrot.slane %v1504_v52, %v5368_v28  ;;  %v1518_v63 = vrot.slane %v1503_v57, %v5368_v28 }
 0x390   : > { %v1464_v53 = vcombine.low %v1455_v8, %v1462_v50 }
 0x391   : > { %v1471_v55 = vrot.slane %v1463_v54, %v5368_v28  ;;  %v1519_v3 = vcombine.low %v1511_v60, %v1518_v63 }
 0x392   : > { %v1478_v61 = vrot.slane %v1464_v53, %v5368_v28 }
 0x394   : > { %v1479_v0 = vcombine.low %v1471_v55, %v1478_v61 }
 0x396   : > { %4456 = vmatprep.mubr.f32.mxu1 %v1479_v0 }
 0x397   : > { %4457 = vmatmul.mubr.f32.vlgmr.msra.gmra.mxu1 %v1519_v3 }
 0x398   : > { %4496 = vmatprep.mubr.msk.f32.mxu1 %vm4956_vm0, %v4955_v2 }
 0x422   : > { %v5689_v11 = vpop.f32.mrf.mxu0 }
 0x424   : > { %v4423_v7 = vpop.f32.mrf.mxu0 }
 0x442   : > { %v4493_v9 = vpop.f32.mrf.mxu0 }
 0x443   : > { %v5692_v10 = vrot.slane %v4493_v9, %v5595_v12 }
 0x444   : > { %v1840_v22 = vpop.f32.mrf.mxu0 }
 0x445   : > { %v5696_v13 = vcombine.high %v5692_v10, %v5692_v10  ;;  %v1851_v15 = vcombine.high %v1840_v22, %v1840_v22  ;;  %v5699_v16 = vrot.slane %v1840_v22, %v5595_v12 }
 0x447   : > { %v2615_v18 = vcombine.low %v5692_v10, %v5696_v13  ;;  %v5704_v19 = vrot.slane %v1851_v15, %v5595_v12  ;;  %v5708_v24 = vcombine.high %v5699_v16, %v5699_v16 }
 0x449   : > { %v2622_v14 = vrot.slane %v2615_v18, %v5595_v12  ;;  %v2607_v25 = vcombine.low %v5708_v24, %v5704_v19  ;;  %v5716_v43 = vcombine.high %v5704_v19, %v5704_v19  ;;  %v1995_v35 = vcombine.low %v5699_v16, %v5708_v24 }
 0x44b   : > { %v2614_v23 = vrot.slane %v2607_v25, %v5595_v12  ;;  %v2633_v26 = vsel %vm2625_vm2, %v2622_v14, -inf  ;;  %v2003_v41 = vcombine.low %v5716_v43, %v5692_v10  ;;  %v2002_v44 = vrot.slane %v1995_v35, %v5595_v12 }
 0x44c   : > { %v2634_v48 = vrot.slane %v2633_v26, 4 }
 0x44d   : > { %v2626_v27 = vsel %vm2625_vm2, %v2614_v23, -inf  ;;  %v2010_v51 = vrot.slane %v2003_v41, %v5595_v12  ;;  %v5740_v50 = vsel %vm2013_vm4, %v2002_v44, -inf  ;;  %vm3105_vm2 = vcmask 23552  }
 0x44e   : > { %v2627_v29 = vrot.slane %v2626_v27, 4  ;;  %v2635_v31 = vmax.f32 %v2633_v26, %v2634_v48  ;;  %v2015_v9 = vrot.slane %v5740_v50, 4 }
 0x44f   : > { %v2021_v22 = vsel %vm2013_vm4, %v2010_v51, -inf }
 0x450   : > { %v2628_v30 = vmax.f32 %v2626_v27, %v2627_v29  ;;  %v2636_v33 = vrot.slane %v2635_v31, 2 }
 0x452   : > { %v2629_v36 = vrot.slane %v2628_v30, 2  ;;  %v2637_v32 = vmax.f32 %v2635_v31, %v2636_v33 }
 0x454   : > { %v2630_v40 = vmax.f32 %v2628_v30, %v2629_v36  ;;  %v2638_v34 = vrot.slane %v2637_v32, 1 }
 0x456   : > { %v2631_v37 = vrot.slane %v2630_v40, 1  ;;  %v2639_v46 = vmax.f32 %v2637_v32, %v2638_v34 }
 0x457   : > { %v4458_v39 = vpop.f32.mrf.mxu1 }
 0x458   : > { %v2632_v38 = vmax.f32 %v2630_v40, %v2631_v37  ;;  %v1648_v42 = vcombine.high %v4458_v39, %v4458_v39  ;;  %v1655_v56 = vrot.slane %v4458_v39, %v5368_v28 }
 0x459   : > { %v1588_v45 = vpop.f32.mrf.mxu1 }
 0x45a   : > { %v2642_v59 = vsel %vm2032_vm3, %v2639_v46, %v2632_v38  ;;  %v1662_v1 = vrot.slane %v1648_v42, %v5368_v28  ;;  %v1663_v5 = vcombine.high %v1655_v56, %v1655_v56  ;;  %v5730_v47 = vrot.slane %v1655_v56, %v5368_v28 }
 0x45b   : > { %v5726_v62 = vmax.f32 %v5689_v11, %v2642_v59  ;;  %v1599_v17 = vcombine.high %v1588_v45, %v1588_v45  ;;  %v1606_v49 = vrot.slane %v1588_v45, %v5368_v28 }
 0x45c   : > { %v5737_v8 = vrot.slane %v1663_v5, %v5368_v28  ;;  %v1664_v55 = vcombine.high %v1662_v1, %v1662_v1  ;;  %v5746_v61 = vcombine.high %v5730_v47, %v5730_v47  ;;  %v5769_v14 = vrot.slane %v1662_v1, %v5368_v28 }
 0x45d   : > { %v2655_v52 = vrot.slane %v5726_v62, %v5368_v28  ;;  %v1613_v54 = vrot.slane %v1599_v17, %v5368_v28  ;;  %v1614_v57 = vcombine.high %v1606_v49, %v1606_v49  ;;  %v5772_v25 = vrot.slane %v1606_v49, %v5368_v28 }
 0x45e   : > { %v5756_v0 = vcombine.high %v5737_v8, %v5737_v8  ;;  %v5787_v29 = vrot.slane %v1664_v55, %v5368_v28  ;;  %v1931_v31 = vcombine.low %v5737_v8, %v5746_v61 }
 0x45f   : > { %v2656_v53 = vcombine.high %v2655_v52, %v2655_v52  ;;  %v2663_v60 = vrot.slane %v2655_v52, %v5368_v28  ;;  %v1615_v3 = vcombine.high %v1613_v54, %v1613_v54  ;;  %v5759_v4 = vrot.slane %v1613_v54, %v5368_v28 }
 0x460   : > { %v5762_v7 = vrot.slane %v1614_v57, %v5368_v28  ;;  %v1932_v30 = vcombine.low %v5756_v0, %v5769_v14 }
 0x461   : > { %v2670_v15 = vrot.slane %v2656_v53, %v5368_v28  ;;  %v2674_v18 = vrot.slane %v2663_v60, %v5238_v21  ;;  %v5775_v23 = vrot.slane %v1615_v3, %v5368_v28  ;;  %v5779_v26 = vcombine.high %v5759_v4, %v5759_v4 }
 0x462   : > { %v1882_v33 = vcombine.low %v5772_v25, %v5762_v7  ;;  %v4115_v36 = vcombine.high %v5772_v25, %v5762_v7  ;;  %v1953_v5 = vrot.slane %v1932_v30, %v5368_v28 }
 0x463   : > { %v2678_v48 = vrot.slane %v2670_v15, %v5238_v21  ;;  %v2685_v27 = vrot.slane %v2674_v18, %v5595_v12  ;;  %v1884_v32 = vcombine.low %v5759_v4, %v5775_v23  ;;  %v5802_v37 = vcombine.high %v5775_v23, %v5775_v23 }
 0x464   : > { %v1891_v46 = vrot.slane %v1882_v33, %v5368_v28  ;;  %v1898_v39 = vrot.slane %v4115_v36, %v5368_v28  ;;  %v1912_v42 = vrot.slane %v5779_v26, %v5368_v28  ;;  %v1960_v18 = vrot.slane %v5787_v29, %v5368_v28 }
 0x465   : > { %v2686_v40 = vcombine.high %v2685_v27, %v2685_v27  ;;  %v2693_v34 = vrot.slane %v2678_v48, %v5595_v12  ;;  %v2702_v35 = vrot.slane %v2685_v27, 7  ;;  %v1905_v41 = vrot.slane %v1884_v32, %v5368_v28 }
 0x466   : > { %v1913_v17 = vcombine.low %v1891_v46, %v1898_v39  ;;  %v1930_v48 = vcombine.low %v5802_v37, %v5730_v47  ;;  %v2022_v27 = vrot.slane %v2021_v22, 4  ;;  %v1946_v36 = vrot.slane %v1931_v31, %v5368_v28 }
 0x467   : > { %v2694_v56 = vcombine.high %v2693_v34, %v2693_v34  ;;  %v2703_v44 = vrot.slane %v2702_v35, 2  ;;  %v2704_v59 = vrot.slane %v2686_v40, 7  ;;  %v2706_v45 = vrot.slane %v2693_v34, 7 }
 0x468   : > { %v2714_v1 = vsub.f32 %v5708_v24, %v2702_v35  ;;  %v1914_v49 = vcombine.low %v1905_v41, %v1912_v42  ;;  %v1921_v55 = vrot.slane %v1913_v17, %v5368_v28  ;;  %v1962_v32 = vcombine.low %v1953_v5, %v1960_v18 }
 0x469   : > { %v2705_v51 = vsel %vm5805_vm12, %v2703_v44, %v2704_v59  ;;  %v2707_v52 = vrot.slane %v2706_v45, 2  ;;  %v2708_v54 = vrot.slane %v2694_v56, 7  ;;  %v2716_v57 = vsub.f32 %v5692_v10, %v2706_v45 }
 0x46a   : > { %v2715_v53 = vsub.f32 %v5704_v19, %v2705_v51  ;;  %v2718_v60 = vmul.f32 1.442695, %v2714_v1  ;;  %v1928_v63 = vrot.slane %v1914_v49, %v5368_v28  ;;  %v1939_v40 = vrot.slane %v1930_v48, %v5368_v28 }
 0x46b   : > { %v2709_v3 = vsel %vm5805_vm12, %v2707_v52, %v2708_v54  ;;  %v2722_v15 = vmul.f32 1.442695, %v2716_v57  ;;  %v2016_v41 = vmax.f32 %v5740_v50, %v2015_v9  ;;  %v2023_v42 = vmax.f32 %v2021_v22, %v2022_v27 }
 0x46c   : > { %v2717_v30 = vsub.f32 %v5696_v13, %v2709_v3  ;;  %v2720_v33 = vmul.f32 1.442695, %v2715_v53  ;;  %v1929_v19 = vcombine.low %v1921_v55, %v1928_v63  ;;  %4707 = vpow2.f32 %v2718_v60 }
 0x46d   : > { %v1961_v46 = vcombine.low %v1939_v40, %v1946_v36  ;;  %v1976_v13 = vrot.slane %v1962_v32, %v5368_v28  ;;  %v2017_v45 = vrot.slane %v2016_v41, 2  ;;  %v2024_v1 = vrot.slane %v2023_v42, 2 }
 0x46e   : > { %4709 = vpow2.f32 %v2720_v33  ;;  %v2724_v34 = vmul.f32 1.442695, %v2717_v30  ;;  %v1981_v35 = vsel %vm1980_vm11, %v1929_v19, -inf }
 0x46f   : > { %4711 = vpow2.f32 %v2722_v15  ;;  %v1982_v39 = vrot.slane %v1981_v35, 4  ;;  %v1969_v56 = vrot.slane %v1961_v46, %v5368_v28  ;;  %v2018_v51 = vmax.f32 %v2016_v41, %v2017_v45 }
 0x470   : > { %4713 = vpow2.f32 %v2724_v34  ;;  %v2025_v52 = vmax.f32 %v2023_v42, %v2024_v1 }
 0x471   : > { %v1983_v44 = vmax.f32 %v1981_v35, %v1982_v39  ;;  %v1977_v31 = vcombine.low %v1969_v56, %v1976_v13  ;;  %v2019_v60 = vrot.slane %v2018_v51, 1 }
 0x472   : > { %v2026_v55 = vrot.slane %v2025_v52, 1 }
 0x473   : > { %v1984_v59 = vrot.slane %v1983_v44, 2  ;;  %v1988_v5 = vsel %vm1980_vm11, %v1977_v31, -inf  ;;  %v2020_v33 = vmax.f32 %v2018_v51, %v2019_v60 }
 0x474   : > { %v1989_v49 = vrot.slane %v1988_v5, 4  ;;  %v2027_v19 = vmax.f32 %v2025_v52, %v2026_v55 }
 0x475   : > { %v1985_v17 = vmax.f32 %v1983_v44, %v1984_v59  ;;  %v4960_v44 = vmov 3  }
 0x476   : > { %v1990_v54 = vmax.f32 %v1988_v5, %v1989_v49  ;;  %4701 = vset.pattern.permute.xlu1 %v4960_v44  ;;  %4702 = vset.pattern.permute.xlu0 %v4960_v44  ;;  %v2645_v49 = vsub.f32 %v5689_v11, %v5726_v62 }
 0x477   : > { %v1986_v50 = vrot.slane %v1985_v17, 1  ;;  %3308 = vperm.xlu1 %4701, %v5686_v6  }
 0x478   : > { %v1991_v9 = vrot.slane %v1990_v54, 2 }
 0x479   : > { %v5836_v57 = vpop.eup %4707  ;;  %v1987_v48 = vmax.f32 %v1985_v17, %v1986_v50 }
 0x47a   : > { %v1992_v3 = vmax.f32 %v1990_v54, %v1991_v9 }
 0x47b   : > { %v5838_v22 = vpop.eup %4709  ;;  %v2028_v40 = vmax.f32 %v1987_v48, %v2020_v33 }
 0x47c   : > { %v5840_v53 = vpop.eup %4711  ;;  %v2730_v63 = vcombine.low %v5836_v57, %v5838_v22  ;;  %v1993_v27 = vrot.slane %v1992_v3, 1 }
 0x47d   : > { %v5844_v15 = vpop.eup %4713 }
 0x47e   : > { %v2738_v18 = vcombine.low %v5840_v53, %v5844_v15  ;;  %v2737_v30 = vrot.slane %v2730_v63, %v5595_v12  ;;  %v1994_v32 = vmax.f32 %v1992_v3, %v1993_v27  ;;  %v2646_v27 = vmul.f32 1.442695, %v2645_v49 }
 0x480   : > { %v2745_v36 = vrot.slane %v2738_v18, %v5595_v12  ;;  %v2029_v34 = vmax.f32 %v1994_v32, %v2027_v19  ;;  %v2746_v35 = vrot.slane %v2737_v30, 1  ;;  %v1644_v18 = vcombine.high %v5772_v25, %v5772_v25 }
 0x481   : > { %4715 = vpow2.f32 %v2646_v27 }
 0x482   : > { %v2747_v46 = vrot.slane %v2745_v36, 1  ;;  %v2033_v39 = vsel %vm2032_vm3, %v2029_v34, %v2028_v40  ;;  %v2750_v42 = vsel %vm2013_vm4, %v2746_v35, 0.0  ;;  %v1646_v35 = vcombine.high %v5762_v7, %v5762_v7 }
 0x483   : > { %v5852_v41 = vmax.f32 %v5689_v11, %v2033_v39  ;;  %v2751_v45 = vrot.slane %v2750_v42, 4 }
 0x484   : > { %v2757_v13 = vsel %vm2013_vm4, %v2747_v46, 0.0 }
 0x485   : > { %v2046_v56 = vrot.slane %v5852_v41, %v5368_v28  ;;  %v2758_v1 = vrot.slane %v2757_v13, 4  ;;  %v2752_v50 = vadd.f32 %v2751_v45, %v2750_v42 }
 0x487   : > { %v2047_v31 = vcombine.high %v2046_v56, %v2046_v56  ;;  %v2054_v59 = vrot.slane %v2046_v56, %v5368_v28  ;;  %v2759_v9 = vadd.f32 %v2758_v1, %v2757_v13  ;;  %v2753_v40 = vrot.slane %v2752_v50, 2 }
 0x489   : > { %v2061_v5 = vrot.slane %v2047_v31, %v5368_v28  ;;  %v2065_v17 = vrot.slane %v2054_v59, %v5238_v21  ;;  %v2760_v34 = vrot.slane %v2759_v9, 2  ;;  %v2754_v49 = vadd.f32 %v2753_v40, %v2752_v50 }
 0x48b   : > { %v2069_v51 = vrot.slane %v2061_v5, %v5238_v21  ;;  %v2070_v52 = vcombine.high %v2065_v17, %v2065_v17  ;;  %v2077_v54 = vrot.slane %v2065_v17, %v5368_v28 }
 0x48d   : > { %v2084_v60 = vrot.slane %v2070_v52, %v5368_v28  ;;  %v2085_v55 = vcombine.high %v2077_v54, %v2077_v54  ;;  %v2093_v63 = vrot.slane %v2077_v54, %v5368_v28  ;;  %v2118_v3 = vcombine.high %v2069_v51, %v2069_v51 }
 0x48e   : > { %v2125_v48 = vrot.slane %v2069_v51, %v5368_v28  ;;  %v2761_v52 = vadd.f32 %v2760_v34, %v2759_v9  ;;  %v2755_v34 = vrot.slane %v2754_v49, 1 }
 0x48f   : > { %v2086_v62 = vcombine.high %v2084_v60, %v2084_v60  ;;  %v2100_v30 = vrot.slane %v2084_v60, %v5368_v28  ;;  %v2107_v33 = vrot.slane %v2085_v55, %v5368_v28  ;;  %v2115_v19 = vcombine.high %v2093_v63, %v2093_v63 }
 0x490   : > { %v2132_v36 = vrot.slane %v2118_v3, %v5368_v28  ;;  %v2133_v32 = vcombine.high %v2125_v48, %v2125_v48  ;;  %v2141_v42 = vrot.slane %v2125_v48, %v5368_v28  ;;  %v2180_v44 = vsub.f32 %v5772_v25, %v2093_v63 }
 0x491   : > { %v2114_v46 = vrot.slane %v2086_v62, %v5368_v28  ;;  %v2117_v39 = vcombine.high %v2107_v33, %v2107_v33  ;;  %v2116_v13 = vcombine.high %v2100_v30, %v2100_v30  ;;  %v2181_v31 = vsub.f32 %v5762_v7, %v2107_v33 }
 0x492   : > { %v2155_v56 = vrot.slane %v2133_v32, %v5368_v28  ;;  %v2182_v59 = vsub.f32 %v1644_v18, %v2115_v19  ;;  %v2134_v1 = vcombine.high %v2132_v36, %v2132_v36  ;;  %v2184_v5 = vsub.f32 %v5759_v4, %v2100_v30 }
 0x493   : > { %v2183_v45 = vsub.f32 %v1646_v35, %v2117_v39  ;;  %v2148_v54 = vrot.slane %v2132_v36, %v5368_v28  ;;  %v2163_v60 = vcombine.high %v2141_v42, %v2141_v42  ;;  %v2185_v55 = vsub.f32 %v5775_v23, %v2114_v46 }
 0x494   : > { %v2228_v3 = vrot.slane %v2065_v17, %v5595_v12  ;;  %v2165_v48 = vcombine.high %v2155_v56, %v2155_v56  ;;  %v2186_v25 = vsub.f32 %v5779_v26, %v2116_v13  ;;  %v2194_v63 = vmul.f32 1.442695, %v2180_v44 }
 0x495   : > { %v2236_v7 = vrot.slane %v2069_v51, %v5595_v12  ;;  %v2187_v18 = vsub.f32 %v5802_v37, %v2141_v42  ;;  %v2196_v27 = vmul.f32 1.442695, %v2181_v31  ;;  %v2198_v62 = vmul.f32 1.442695, %v2182_v59 }
 0x496   : > { %v2200_v4 = vmul.f32 1.442695, %v2183_v45  ;;  %v2162_v50 = vrot.slane %v2134_v1, %v5368_v28  ;;  %v2188_v9 = vsub.f32 %v5730_v47, %v2155_v56  ;;  %4717 = vpow2.f32 %v2194_v63  ;;  %v5897_v56 = vpop.eup %4715 }
 0x497   : > { %v2202_v30 = vmul.f32 1.442695, %v2184_v5  ;;  %v2164_v23 = vcombine.high %v2148_v54, %v2148_v54  ;;  %v2189_v17 = vsub.f32 %v5737_v8, %v2163_v60  ;;  %4719 = vpow2.f32 %v2196_v27 }
 0x498   : > { %v2204_v33 = vmul.f32 1.442695, %v2185_v55  ;;  %v2190_v26 = vsub.f32 %v5746_v61, %v2165_v48  ;;  %4721 = vpow2.f32 %v2198_v62  ;;  %v2206_v51 = vmul.f32 1.442695, %v2186_v25 }
 0x499   : > { %v2762_v19 = vrot.slane %v2761_v52, 1  ;;  %v2191_v37 = vsub.f32 %v5756_v0, %v2148_v54  ;;  %4723 = vpow2.f32 %v2200_v4  ;;  %v2208_v36 = vmul.f32 1.442695, %v2187_v18 }
 0x49a   : > { %v2229_v32 = vcombine.high %v2228_v3, %v2228_v3  ;;  %v2192_v40 = vsub.f32 %v5769_v14, %v2162_v50  ;;  %4725 = vpow2.f32 %v2202_v30  ;;  %v2210_v47 = vmul.f32 1.442695, %v2188_v9 }
 0x49b   : > { %v2193_v35 = vsub.f32 %v5787_v29, %v2164_v23  ;;  %4727 = vpow2.f32 %v2204_v33  ;;  %v2212_v8 = vmul.f32 1.442695, %v2189_v17  ;;  %v2237_v46 = vcombine.high %v2236_v7, %v2236_v7 }
 0x49c   : > { %4729 = vpow2.f32 %v2206_v51  ;;  %v2214_v61 = vmul.f32 1.442695, %v2190_v26  ;;  %v2242_v39 = vsub.f32 %v5699_v16, %v2228_v3  ;;  %v2216_v42 = vmul.f32 1.442695, %v2191_v37 }
 0x49d   : > { %4731 = vpow2.f32 %v2208_v36  ;;  %v2243_v0 = vsub.f32 %v5708_v24, %v2229_v32  ;;  %v2763_v13 = vadd.f32 %v2762_v19, %v2761_v52  ;;  %v2218_v14 = vmul.f32 1.442695, %v2192_v40 }
 0x49e   : > { %4733 = vpow2.f32 %v2210_v47  ;;  %v2244_v44 = vsub.f32 %v5716_v43, %v2236_v7  ;;  %v2220_v29 = vmul.f32 1.442695, %v2193_v35  ;;  %v2245_v31 = vsub.f32 %v5692_v10, %v2237_v46 }
 0x49f   : > { %4735 = vpow2.f32 %v2212_v8  ;;  %v2756_v59 = vadd.f32 %v2755_v34, %v2754_v49  ;;  %v2246_v45 = vmul.f32 1.442695, %v2242_v39  ;;  %v2248_v16 = vmul.f32 1.442695, %v2243_v0 }
 0x4a0   : > { %4737 = vpow2.f32 %v2214_v61  ;;  %v2250_v24 = vmul.f32 1.442695, %v2244_v44  ;;  %v2252_v52 = vmul.f32 1.442695, %v2245_v31  ;;  %v2036_v0 = vsub.f32 %v5689_v11, %v5852_v41 }
 0x4a1   : > { %4739 = vpow2.f32 %v2216_v42  ;;  %v2766_v1 = vsel %vm2032_vm3, %v2763_v13, %v2756_v59 }
 0x4a2   : > { %4741 = vpow2.f32 %v2218_v14  ;;  %v2768_v43 = vadd.f32 %v5897_v56, %v2766_v1 }
 0x4a3   : > { %v5902_v5 = vpop.eup %4717  ;;  %4743 = vpow2.f32 %v2220_v29 }
 0x4a4   : > { %v5904_v54 = vpop.eup %4719  ;;  %4745 = vpow2.f32 %v2246_v45 }
 0x4a5   : > { %v5907_v60 = vpop.eup %4721  ;;  %4747 = vpow2.f32 %v2248_v16  ;;  %v2268_v10 = vcombine.low %v5902_v5, %v5904_v54 }
 0x4a6   : > { %v5911_v49 = vpop.eup %4723  ;;  %4749 = vpow2.f32 %v2250_v24 }
 0x4a7   : > { %v5913_v55 = vpop.eup %4725  ;;  %4751 = vpow2.f32 %v2252_v52  ;;  %v2269_v3 = vcombine.low %v5907_v60, %v5911_v49  ;;  %v2277_v7 = vrot.slane %v2268_v10, %v5368_v28  ;;  %v2037_v52 = vmul.f32 1.442695, %v2036_v0 }
 0x4a8   : > { %v5917_v48 = vpop.eup %4727  ;;  %4753 = vrcp.f32 %v2768_v43 }
 0x4a9   : > { %v5919_v25 = vpop.eup %4729  ;;  %v2270_v63 = vcombine.low %v5913_v55, %v5917_v48  ;;  %v2284_v18 = vrot.slane %v2269_v3, %v5368_v28  ;;  %4755 = vpow2.f32 %v2037_v52 }
 0x4aa   : > { %v5925_v27 = vpop.eup %4731  ;;  %v2298_v50 = vrot.slane %v5919_v25, %v5368_v28 }
 0x4ab   : > { %v5927_v62 = vpop.eup %4733  ;;  %v2291_v4 = vrot.slane %v2270_v63, %v5368_v28  ;;  %v2299_v9 = vcombine.low %v2277_v7, %v2284_v18 }
 0x4ac   : > { %v5932_v30 = vpop.eup %4735  ;;  %v2316_v23 = vcombine.low %v5925_v27, %v5927_v62 }
 0x4ad   : > { %v5936_v17 = vpop.eup %4737  ;;  %v2300_v33 = vcombine.low %v2291_v4, %v2298_v50  ;;  %v2307_v26 = vrot.slane %v2299_v9, %v5368_v28 }
 0x4ae   : > { %v5939_v51 = vpop.eup %4739  ;;  %v2317_v19 = vcombine.low %v5932_v30, %v5936_v17  ;;  %v2325_v47 = vrot.slane %v2316_v23, %v5368_v28 }
 0x4af   : > { %v5943_v37 = vpop.eup %4741  ;;  %v2314_v36 = vrot.slane %v2300_v33, %v5368_v28 }
 0x4b0   : > { %v5946_v32 = vpop.eup %4743  ;;  %v2318_v40 = vcombine.low %v5939_v51, %v5943_v37  ;;  %v2332_v34 = vrot.slane %v2317_v19, %v5368_v28 }
 0x4b1   : > { %v5952_v35 = vpop.eup %4745  ;;  %v2315_v8 = vcombine.low %v2307_v26, %v2314_v36  ;;  %v2346_v39 = vrot.slane %v5946_v32, %v5368_v28 }
 0x4b2   : > { %v5954_v46 = vpop.eup %4747  ;;  %v2339_v61 = vrot.slane %v2318_v40, %v5368_v28  ;;  %v2347_v42 = vcombine.low %v2325_v47, %v2332_v34 }
 0x4b3   : > { %v5961_v13 = vpop.eup %4749  ;;  %v2366_v14 = vsel %vm1980_vm11, %v2315_v8, 0.0  ;;  %v2389_v44 = vcombine.low %v5952_v35, %v5954_v46 }
 0x4b4   : > { %v5966_v29 = vpop.eup %4751  ;;  %v2348_v31 = vcombine.low %v2339_v61, %v2346_v39  ;;  %v2355_v59 = vrot.slane %v2347_v42, %v5368_v28  ;;  %v2367_v45 = vrot.slane %v2366_v14, 4 }
 0x4b5   : > { %v5969_v16 = vpop.eup %4753  ;;  %v2396_v1 = vrot.slane %v2389_v44, %v5595_v12  ;;  %v2397_v11 = vcombine.low %v5961_v13, %v5966_v29 }
 0x4b6   : > { %v2362_v41 = vrot.slane %v2348_v31, %v5368_v28  ;;  %v2368_v24 = vadd.f32 %v2367_v45, %v2366_v14  ;;  %v5977_v43 = vrot.slane %v5969_v16, %v5368_v28 }
 0x4b7   : > { %v2404_v10 = vrot.slane %v2397_v11, %v5595_v12  ;;  %v2407_v3 = vsel %vm2013_vm4, %v2396_v1, 0.0 }
 0x4b8   : > { %v2363_v63 = vcombine.low %v2355_v59, %v2362_v41  ;;  %v2408_v7 = vrot.slane %v2407_v3, 4  ;;  %v2369_v18 = vrot.slane %v2368_v24, 2  ;;  %v2779_v50 = vcombine.high %v5977_v43, %v5977_v43 }
 0x4b9   : > { %v2414_v4 = vsel %vm2013_vm4, %v2404_v10, 0.0  ;;  %vm3348_vm4 = vcmask 15360  }
 0x4ba   : > { %v2373_v9 = vsel %vm1980_vm11, %v2363_v63, 0.0  ;;  %v2409_v23 = vadd.f32 %v2408_v7, %v2407_v3  ;;  %v2415_v33 = vrot.slane %v2414_v4, 4  ;;  %v2793_v19 = vrot.slane %v2779_v50, %v5368_v28 }
 0x4bb   : > { %v2374_v26 = vrot.slane %v2373_v9, 4  ;;  %v2370_v47 = vadd.f32 %v2369_v18, %v2368_v24 }
 0x4bc   : > { %v2410_v36 = vrot.slane %v2409_v23, 2  ;;  %v2416_v40 = vadd.f32 %v2415_v33, %v2414_v4  ;;  %v2801_v8 = vrot.slane %v2793_v19, %v5238_v21  ;;  %v4756_v4 = vpop.eup %4755 }
 0x4bd   : > { %v2375_v34 = vadd.f32 %v2374_v26, %v2373_v9  ;;  %v2371_v44 = vrot.slane %v2370_v47, 1 }
 0x4be   : > { %v2417_v61 = vrot.slane %v2416_v40, 2  ;;  %v2411_v42 = vadd.f32 %v2410_v36, %v2409_v23  ;;  %v2816_v0 = vrot.slane %v2801_v8, %v5595_v12 }
 0x4bf   : > { %v2376_v39 = vrot.slane %v2375_v34, 2  ;;  %v2372_v3 = vadd.f32 %v2371_v44, %v2370_v47 }
 0x4c0   : > { %v2418_v14 = vadd.f32 %v2417_v61, %v2416_v40  ;;  %v2817_v45 = vcombine.high %v2816_v0, %v2816_v0  ;;  %v2822_v1 = vrot.slane %v2816_v0, 7  ;;  %v2412_v41 = vrot.slane %v2411_v42, 1 }
 0x4c1   : > { %v2377_v31 = vadd.f32 %v2376_v39, %v2375_v34 }
 0x4c2   : > { %v2419_v59 = vrot.slane %v2418_v14, 1  ;;  %v2823_v52 = vrot.slane %v2822_v1, 2  ;;  %v2824_v10 = vrot.slane %v2817_v45, 7  ;;  %v5989_v7 = vmul.f32 %v5840_v53, %v2822_v1 }
 0x4c3   : > { %v2378_v11 = vrot.slane %v2377_v31, 1  ;;  %v2413_v9 = vadd.f32 %v2412_v41, %v2411_v42 }
 0x4c4   : > { %v2420_v63 = vadd.f32 %v2419_v59, %v2418_v14  ;;  %v2825_v18 = vsel %vm5805_vm12, %v2823_v52, %v2824_v10 }
 0x4c5   : > { %v2379_v24 = vadd.f32 %v2378_v11, %v2377_v31  ;;  %v5995_v23 = vmul.f32 %v5844_v15, %v2825_v18 }
 0x4c6   : > { %v2423_v26 = vsel %vm2032_vm3, %v2420_v63, %v2413_v9 }
 0x4c7   : > { %v2382_v50 = vsel %vm2032_vm3, %v2379_v24, %v2372_v3  ;;  %v3332_v19 = vcombine.low %v5989_v7, %v5995_v23 }
 0x4c8   : > { %v2384_v33 = vadd.f32 %v4756_v4, %v2382_v50 }
 0x4ca   : > { %v2425_v36 = vadd.f32 %v2423_v26, %v2384_v33 }
 0x4cc   : > { %4757 = vrcp.f32 %v2425_v36 }
 0x4d9   : > { %v4758_v53 = vpop.eup %4757 }
 0x4da   : > { %v6000_v40 = vmul.f32 %v4758_v53, %v4756_v4  ;;  %v2435_v47 = vrot.slane %v4758_v53, %v5368_v28 }
 0x4dc   : > { %v2443_v34 = vrot.slane %v2435_v47, %v5368_v28  ;;  %v2436_v8 = vcombine.high %v2435_v47, %v2435_v47 }
 0x4de   : > { %v2454_v61 = vrot.slane %v2443_v34, %v5238_v21  ;;  %v2450_v15 = vrot.slane %v2436_v8, %v5368_v28 }
 0x4e0   : > { %v2459_v39 = vcombine.high %v2454_v61, %v2454_v61  ;;  %v2466_v42 = vrot.slane %v2454_v61, %v5368_v28  ;;  %v2458_v0 = vrot.slane %v2450_v15, %v5238_v21  ;;  %v2589_v14 = vrot.slane %v2454_v61, %v5595_v12 }
 0x4e2   : > { %v2473_v44 = vrot.slane %v2459_v39, %v5368_v28  ;;  %v2474_v31 = vcombine.high %v2466_v42, %v2466_v42  ;;  %v2482_v59 = vrot.slane %v2466_v42, %v5368_v28  ;;  %v2507_v45 = vcombine.high %v2458_v0, %v2458_v0 }
 0x4e3   : > { %v2514_v1 = vrot.slane %v2458_v0, %v5368_v28  ;;  %v2590_v10 = vcombine.high %v2589_v14, %v2589_v14 }
 0x4e4   : > { %v2475_v11 = vcombine.high %v2473_v44, %v2473_v44  ;;  %v2489_v41 = vrot.slane %v2473_v44, %v5368_v28  ;;  %v2496_v52 = vrot.slane %v2474_v31, %v5368_v28  ;;  %v2504_v3 = vcombine.high %v2482_v59, %v2482_v59 }
 0x4e5   : > { %v2569_v24 = vmul.f32 %v5902_v5, %v2482_v59  ;;  %v2521_v63 = vrot.slane %v2507_v45, %v5368_v28  ;;  %v2522_v18 = vcombine.high %v2514_v1, %v2514_v1  ;;  %v2530_v47 = vrot.slane %v2514_v1, %v5368_v28 }
 0x4e6   : > { %v2503_v4 = vrot.slane %v2475_v11, %v5368_v28  ;;  %v2505_v50 = vcombine.high %v2489_v41, %v2489_v41  ;;  %v2506_v9 = vcombine.high %v2496_v52, %v2496_v52  ;;  %v2570_v33 = vmul.f32 %v5904_v54, %v2496_v52 }
 0x4e7   : > { %v2571_v26 = vmul.f32 %v5907_v60, %v2504_v3  ;;  %v2573_v36 = vmul.f32 %v5913_v55, %v2489_v41  ;;  %v2523_v53 = vcombine.high %v2521_v63, %v2521_v63  ;;  %v2537_v15 = vrot.slane %v2521_v63, %v5368_v28 }
 0x4e8   : > { %v2572_v34 = vmul.f32 %v5911_v49, %v2506_v9  ;;  %v2574_v5 = vmul.f32 %v5917_v48, %v2503_v4  ;;  %v2575_v8 = vmul.f32 %v5919_v25, %v2505_v50  ;;  %v2843_v61 = vcombine.low %v2569_v24, %v2570_v33 }
 0x4e9   : > { %v2544_v39 = vrot.slane %v2522_v18, %v5368_v28  ;;  %v2551_v54 = vrot.slane %v2523_v53, %v5368_v28  ;;  %v2552_v42 = vcombine.high %v2530_v47, %v2530_v47  ;;  %v2553_v59 = vcombine.high %v2537_v15, %v2537_v15 }
 0x4ea   : > { %v2844_v60 = vcombine.low %v2571_v26, %v2572_v34  ;;  %v2845_v44 = vcombine.low %v2573_v36, %v2574_v5  ;;  %v2852_v55 = vrot.slane %v2843_v61, %v5368_v28  ;;  %v2873_v31 = vrot.slane %v2575_v8, %v5368_v28 }
 0x4eb   : > { %v2554_v49 = vcombine.high %v2544_v39, %v2544_v39  ;;  %v2576_v48 = vmul.f32 %v5925_v27, %v2530_v47  ;;  %v2577_v25 = vmul.f32 %v5927_v62, %v2544_v39  ;;  %v2578_v11 = vmul.f32 %v5932_v30, %v2552_v42 }
 0x4ec   : > { %v2859_v45 = vrot.slane %v2844_v60, %v5368_v28  ;;  %v2866_v1 = vrot.slane %v2845_v44, %v5368_v28  ;;  %v2580_v41 = vmul.f32 %v5939_v51, %v2537_v15  ;;  %v2581_v3 = vmul.f32 %v5943_v37, %v2551_v54  ;;  %v3313_v15 = vld [vmem:[#allocation7] sm:$0x3] }
 0x4ed   : > { %v2579_v52 = vmul.f32 %v5936_v17, %v2554_v49  ;;  %v2582_v24 = vmul.f32 %v5946_v32, %v2553_v59  ;;  %v2975_v63 = vcombine.low %v2576_v48, %v2577_v25  ;;  %v2603_v62 = vmul.f32 %v5952_v35, %v2589_v14 }
 0x4ee   : > { %v2874_v18 = vcombine.low %v2852_v55, %v2859_v45  ;;  %v2875_v27 = vcombine.low %v2866_v1, %v2873_v31  ;;  %v2604_v4 = vmul.f32 %v5954_v46, %v2590_v10  ;;  %v2977_v9 = vcombine.low %v2580_v41, %v2581_v3  ;;  %v2834_v46 = vld [vmem:[%s5173_s23] sm:$0xff] }
 0x4ef   : > { %v2976_v50 = vcombine.low %v2578_v11, %v2579_v52  ;;  %v2597_v37 = vrot.slane %v2458_v0, %v5595_v12  ;;  %v2984_v32 = vrot.slane %v2975_v63, %v5368_v28  ;;  %v3005_v35 = vrot.slane %v2582_v24, %v5368_v28  ;;  %v3299_v11 = vpop.permute.xlu1 %3298 }
 0x4f0   : > { %v2882_v30 = vrot.slane %v2874_v18, %v5368_v28  ;;  %v2889_v51 = vrot.slane %v2875_v27, %v5368_v28  ;;  %v3097_v17 = vcombine.low %v2603_v62, %v2604_v4  ;;  %v2998_v26 = vrot.slane %v2977_v9, %v5368_v28 }
 0x4f1   : > { %v2991_v33 = vrot.slane %v2976_v50, %v5368_v28  ;;  %v2598_v10 = vcombine.high %v2597_v37, %v2597_v37  ;;  %v2605_v47 = vmul.f32 %v5961_v13, %v2597_v37  ;;  %v2786_v39 = vrot.slane %v5977_v43, %v5368_v28 }
 0x4f2   : > { %v2890_v14 = vcombine.low %v2882_v30, %v2889_v51  ;;  %v3007_v53 = vcombine.low %v2998_v26, %v3005_v35  ;;  %v3104_v13 = vrot.slane %v3097_v17, %v5595_v12  ;;  %v2770_v51 = vmul.f32 %v5969_v16, %v5897_v56 }
 0x4f3   : > { %v3006_v36 = vcombine.low %v2984_v32, %v2991_v33  ;;  %v2606_v0 = vmul.f32 %v5966_v29, %v2598_v10  ;;  %v2797_v54 = vrot.slane %v2786_v39, %v5238_v21  ;;  %v3309_v38 = vpop.permute.xlu1 %3308  ;;  %v3339_v10 = vrot.slane %v3332_v19, %v5595_v12 }
 0x4f4   : > { %4495 = vmatpush3.msk.msra.mxu1 %vm2895_vm13, %v2890_v14  ;;  %v3021_v5 = vrot.slane %v3007_v53, %v5368_v28 }
 0x4f5   : > { %4497 = vmatmul.mubr.msk.f32.vlgmr.msra.gmra.mxu1 %vm2891_vm14, %v2834_v46  ;;  %4499 = vmatprep.subr.mxu1 %v4955_v2  ;;  %v3014_v34 = vrot.slane %v3006_v36, %v5368_v28  ;;  %v3184_v8 = vcombine.low %v2605_v47, %v2606_v0  ;;  %v2808_v42 = vrot.slane %v2797_v54, %v5595_v12 }
 0x4f6   : > { %4501 = vmatprep.mubr.msk.f32.mxu1 %vm4956_vm0, %v4955_v2 }
 0x4f7   : > { %v3022_v61 = vcombine.low %v3014_v34, %v3021_v5  ;;  %v3191_v29 = vrot.slane %v3184_v8, %v5595_v12  ;;  %v2809_v60 = vcombine.high %v2808_v42, %v2808_v42  ;;  %v2818_v44 = vrot.slane %v2808_v42, 7 }
 0x4f9   : > { %4500 = vmatpush3.msk.msra.mxu1 %vm2895_vm13, %v3022_v61  ;;  %v2819_v55 = vrot.slane %v2818_v44, 2  ;;  %v2820_v31 = vrot.slane %v2809_v60, 7  ;;  %v2830_v24 = vmul.f32 %v5836_v57, %v2818_v44 }
 0x4fa   : > { %4504 = vmatprep.subr.mxu1 %v4955_v2  ;;  %4502 = vmatmul.mubr.msk.f32.vlgmr.msra.gmra.mxu1 %vm2891_vm14, %v2834_v46  ;;  %v3315_v46 = vrot.slane %v2770_v51, 1 }
 0x4fb   : > { %4505 = vmatpush3.msk.msra.mxu1 %vm3109_vm15, %v3104_v13  ;;  %4506 = vmatprep.mubr.msk.f32.mxu1 %vm4956_vm0, %v4955_v2  ;;  %v2821_v25 = vsel %vm5805_vm12, %v2819_v55, %v2820_v31  ;;  %v3762_v55 = vld [vmem:[%s5159_s6 + $0x2f0] sm:$0xff]  ;;  %v3761_v31 = vld [vmem:[%s5159_s6 + $0x2c0] sm:$0xff] }
 0x4fc   : > { %4509 = vmatprep.subr.mxu1 %v4955_v2  ;;  %v2831_v41 = vmul.f32 %v5838_v22, %v2821_v25  ;;  %v3757_v25 = vld [vmem:[%s5159_s6 + $0x200] sm:$0xff] }
 0x4fe   : > { %4507 = vmatmul.mubr.msk.f32.vlgmr.msra.gmra.mxu1 %vm3105_vm2, %v5686_v6  ;;  %v3324_v27 = vcombine.low %v2830_v24, %v2831_v41  ;;  %v3752_v41 = vld [vmem:[%s5159_s6 + $0x110] sm:$0xff]  ;;  %v3850_v24 = vld [vmem:[%s5159_s6 + $0x298] sm:$0xff] }
 0x4ff   : > { %4510 = vmatpush3.msk.msra.mxu1 %vm3109_vm15, %v3191_v29  ;;  %4511 = vmatprep.mubr.msk.f32.mxu1 %vm4956_vm0, %v4955_v2 }
 0x500   : > { %4514 = vmatprep.subr.mxu1 %v4955_v2  ;;  %v3331_v22 = vrot.slane %v3324_v27, %v5595_v12  ;;  %v3749_v27 = vld [vmem:[%s5159_s6 + $0x80] sm:$0xff] }
 0x502   : > { %4512 = vmatmul.mubr.msk.f32.vlgmr.msra.gmra.mxu1 %vm3105_vm2, %v5686_v6  ;;  %v3271_v6 = vrot.slane %v6000_v40, %v5368_v28 }
 0x503   : > { %4516 = vmatprep.mubr.msk.f32.mxu1 %vm4956_vm0, %v4955_v2  ;;  %4515 = vmatpush3.msk.msra.mxu1 %vm554_vm1, %v3313_v15 }
 0x504   : > { %4519 = vmatprep.subr.mxu1 %v4955_v2  ;;  %v3272_v59 = vcombine.high %v3271_v6, %v3271_v6  ;;  %v3279_v49 = vrot.slane %v3271_v6, %v5368_v28 }
 0x506   : > { %v3286_v43 = vrot.slane %v3272_v59, %v5368_v28  ;;  %v3290_v45 = vrot.slane %v3279_v49, %v5238_v21  ;;  %v3760_v59 = vld [vmem:[%s5159_s6 + $0x290] sm:$0xff]  ;;  %v3759_v49 = vld [vmem:[%s5159_s6 + $0x260] sm:$0xff] }
 0x508   : > { %v3294_v40 = vrot.slane %v3286_v43, %v5238_v21  ;;  %v3301_v3 = vmul.f32 %v3299_v11, %v3290_v45  ;;  %v3756_v43 = vld [vmem:[%s5159_s6 + $0x1d0] sm:$0xff]  ;;  %v3755_v45 = vld [vmem:[%s5159_s6 + $0x1a0] sm:$0xff] }
 0x50a   : > { %v3302_v4 = vmul.f32 %v3299_v11, %v3294_v40  ;;  %v3753_v11 = vld [vmem:[%s5159_s6 + $0x140] sm:$0xff]  ;;  %v3851_v40 = vld [vmem:[%s5159_s6 + $0x2c8] sm:$0xff] }
 0x5b5   : > { %v2964_v48 = vpop.f32.mrf.mxu1 }
 0x5b6   : > { %v3303_v18 = vadd.f32 %v3301_v3, %v2964_v48  ;;  %v3758_v48 = vld [vmem:[%s5159_s6 + $0x230] sm:$0xff]  ;;  %v3751_v3 = vld [vmem:[%s5159_s6 + $0xe0] sm:$0xff] }
 0x5b7   : > { %v4498_v1 = vpop.f32.mrf.mxu1 }
 0x5b8   : > { %v3754_v1 = vld [vmem:[%s5159_s6 + $0x170] sm:$0xff] }
 0x5ba   : > { %v3091_v52 = vpop.f32.mrf.mxu1 }
 0x5bb   : > { %v3304_v30 = vadd.f32 %v3302_v4, %v3091_v52  ;;  %v3852_v52 = vld [vmem:[%s5159_s6 + $0x2f8] sm:$0xff]  ;;  %v3847_v4 = vld [vmem:[%s5159_s6 + $0x208] sm:$0xff] }
 0x5bc   : > { %v4503_v63 = vpop.f32.mrf.mxu1  ;;  %4560 = vmatpush3.msra.mxu0 %v3852_v52 }
 0x5bd   : > { %4561 = vmatprep.subr.mxu0 %v4955_v2  ;;  %v3750_v63 = vld [vmem:[%s5159_s6 + $0xb0] sm:$0xff] }
 0x5be   : > { %v3178_v62 = vpop.f32.mrf.mxu1  ;;  %4562 = vmatpush3.msra.mxu0 %v3851_v40  ;;  %v778_v40 = vsub.s32 6, %v5235_v20 }
 0x5bf   : > { %v3305_v50 = vadd.f32 %v3303_v18, %v3178_v62  ;;  %4563 = vmatprep.subr.mxu0 %v4955_v2  ;;  %v3849_v18 = vld [vmem:[%s5159_s6 + $0x268] sm:$0xff]  ;;  %v3848_v62 = vld [vmem:[%s5159_s6 + $0x238] sm:$0xff] }
 0x5c0   : > { %v4508_v9 = vpop.f32.mrf.mxu1  ;;  %4564 = vmatpush3.msra.mxu0 %v3850_v24 }
 0x5c1   : > { %v3311_v17 = vadd.f32 %v3309_v38, %v3305_v50  ;;  %4565 = vmatprep.subr.mxu0 %v4955_v2  ;;  %v3747_v50 = vld [vmem:[%s5159_s6 + $0x20] sm:$0xff]  ;;  %v3846_v9 = vld [vmem:[%s5159_s6 + $0x1d8] sm:$0xff] }
 0x5c2   : > { %v3260_v37 = vpop.f32.mrf.mxu1  ;;  %4566 = vmatpush3.msra.mxu0 %v3849_v18 }
 0x5c3   : > { %v3318_v32 = vadd.f32 %v3311_v17, %v2770_v51  ;;  %v3342_v33 = vadd.f32 %v3331_v22, %v3311_v17  ;;  %v3306_v26 = vadd.f32 %v3304_v30, %v3260_v37  ;;  %4567 = vmatprep.subr.mxu0 %v4955_v2  ;;  %v3845_v30 = vld [vmem:[%s5159_s6 + $0x1a8] sm:$0xff]  ;;  %v3844_v51 = vld [vmem:[%s5159_s6 + $0x178] sm:$0xff] }
 0x5c4   : > { %v4513_v57 = vpop.f32.mrf.mxu1  ;;  %4568 = vmatpush3.msra.mxu0 %v3848_v62  ;;  %v3843_v17 = vld [vmem:[%s5159_s6 + $0x148] sm:$0xff]  ;;  %v3842_v22 = vld [vmem:[%s5159_s6 + $0x118] sm:$0xff] }
 0x5c5   : > { %v3432_v35 = vrot.slane %v3342_v33, %v5368_v28  ;;  %v3312_v14 = vadd.f32 %v3309_v38, %v3306_v26  ;;  %v3748_v38 = vld [vmem:[%s5159_s6 + $0x50] sm:$0xff]  ;;  %4569 = vmatprep.subr.mxu0 %v4955_v2  ;;  %v3841_v37 = vld [vmem:[%s5159_s6 + $0xe8] sm:$0xff] }
 0x5c6   : > { %4570 = vmatpush3.msra.mxu0 %v3847_v4  ;;  %v3839_v33 = vld [vmem:[%s5159_s6 + $0x88] sm:$0xff] }
 0x5c7   : > { %v3433_v36 = vcombine.high %v3432_v35, %v3432_v35  ;;  %v3440_v56 = vrot.slane %v3432_v35, %v5368_v28  ;;  %v3319_v16 = vadd.f32 %v3315_v46, %v3312_v14  ;;  %v3343_v53 = vadd.f32 %v3339_v10, %v3312_v14  ;;  %4571 = vmatprep.subr.mxu0 %v4955_v2  ;;  %v4129_v35 = vld.sshfl [vmem:[%s5167_s18 + $0x18] sm:$0xff pattern:$0x75316420] }
 0x5c8   : > { %4572 = vmatpush3.msra.mxu0 %v3846_v9  ;;  %v3649_v14 = vcombine.high %v4129_v35, %v4129_v35  ;;  %v3656_v46 = vrot.slane %v4129_v35, %v5368_v28 }
 0x5c9   : > { %v3447_v47 = vrot.slane %v3433_v36, %v5368_v28  ;;  %v3448_v0 = vcombine.high %v3440_v56, %v3440_v56  ;;  %v3346_v34 = vrot.slane %v3319_v16, 7  ;;  %v3456_v5 = vrot.slane %v3343_v53, %v5368_v28  ;;  %4573 = vmatprep.subr.mxu0 %v4955_v2 }
 0x5ca   : > { %4574 = vmatpush3.msra.mxu0 %v3845_v30  ;;  %v3663_v16 = vrot.slane %v3649_v14, %v5368_v28 }
 0x5cb   : > { %v3457_v8 = vcombine.high %v3456_v5, %v3456_v5  ;;  %v3347_v61 = vsel %vm2032_vm3, %v3346_v34, %v3318_v32  ;;  %v3449_v13 = vcombine.high %v3447_v47, %v3447_v47  ;;  %v3474_v29 = vcombine.low %v3447_v47, %v3448_v0  ;;  %4575 = vmatprep.subr.mxu0 %v4955_v2  ;;  %v3840_v32 = vld [vmem:[%s5159_s6 + $0xb8] sm:$0xff] }
 0x5cc   : > { %v3464_v7 = vrot.slane %v3456_v5, %v5368_v28  ;;  %4517 = vmatmul.mubr.msk.f32.vlgmr.msra.gmra.mxu1 %vm3348_vm4, %v3347_v61  ;;  %4576 = vmatpush3.msra.mxu0 %v3844_v51  ;;  %v3664_v5 = vcombine.high %v3656_v46, %v3656_v46 }
 0x5cd   : > { %v3471_v12 = vrot.slane %v3457_v8, %v5368_v28  ;;  %4520 = vmatpush3.msk.msra.mxu1 %vm554_vm1, %v3313_v15  ;;  %4521 = vmatprep.mubr.msk.f32.mxu1 %vm4956_vm0, %v4955_v2  ;;  %v3483_v39 = vrot.slane %v3474_v29, %v5368_v28 }
 0x5ce   : > { %4524 = vmatprep.subr.mxu1 %v4955_v2  ;;  %4577 = vmatprep.subr.mxu0 %v4955_v2 }
 0x5cf   : > { %v3475_v23 = vcombine.low %v3449_v13, %v3471_v12  ;;  %v4126_v19 = vcombine.high %v3464_v7, %v3471_v12  ;;  %4578 = vmatpush3.msra.mxu0 %v3843_v17 }
 0x5d0   : > { %4579 = vmatprep.subr.mxu0 %v4955_v2 }
 0x5d1   : > { %v3490_v54 = vrot.slane %v3475_v23, %v5368_v28  ;;  %v3497_v42 = vrot.slane %v4126_v19, %v5368_v28  ;;  %4580 = vmatpush3.msra.mxu0 %v3842_v22 }
 0x5d2   : > { %4581 = vmatprep.subr.mxu0 %v4955_v2 }
 0x5d3   : > { %v3498_v60 = vcombine.low %v3483_v39, %v3490_v54  ;;  %v3512_v44 = vrot.slane %v3497_v42, %v5368_v28  ;;  %4582 = vmatpush3.msra.mxu0 %v3841_v37  ;;  %v3838_v37 = vld [vmem:[%s5159_s6 + $0x58] sm:$0xff] }
 0x5d4   : > { %4583 = vmatprep.subr.mxu0 %v4955_v2 }
 0x5d5   : > { %v3505_v15 = vrot.slane %v3498_v60, %v5368_v28  ;;  %4584 = vmatpush3.msra.mxu0 %v3840_v32  ;;  %v3837_v32 = vld [vmem:[%s5159_s6 + $0x28] sm:$0xff] }
 0x5d6   : > { %4585 = vmatprep.subr.mxu0 %v4955_v2 }
 0x5d7   : > { %v3513_v6 = vcombine.low %v3505_v15, %v3512_v44  ;;  %4586 = vmatpush3.msra.mxu0 %v3839_v33  ;;  %v3765_v33 = vsub.s32 7, %v5235_v20 }
 0x5d8   : > { %4587 = vmatprep.subr.mxu0 %v4955_v2 }
 0x5d9   : > { %4522 = vmatmul.mubr.msk.f32.vlgmr.msra.gmra.mxu1 %vm3348_vm4, %v3513_v6  ;;  %4588 = vmatpush3.msra.mxu0 %v3838_v37 }
 0x5da   : > { %4556 = vmatprep.mubr.msk.f32.mxu1 %vm4956_vm0, %v4955_v2  ;;  %4525 = vmatpush3.msra.mxu1 %v3762_v55 }
 0x5db   : > { %4526 = vmatprep.subr.mxu1 %v4955_v2  ;;  %4589 = vmatprep.subr.mxu0 %v4955_v2 }
 0x5dc   : > { %4527 = vmatpush3.msra.mxu1 %v3761_v31  ;;  %4590 = vmatpush3.msra.mxu0 %v3837_v32 }
 0x5dd   : > { %4528 = vmatprep.subr.mxu1 %v4955_v2 }
 0x5de   : > { %4529 = vmatpush3.msra.mxu1 %v3760_v59 }
 0x5df   : > { %4530 = vmatprep.subr.mxu1 %v4955_v2 }
 0x5e0   : > { %4531 = vmatpush3.msra.mxu1 %v3759_v49 }
 0x5e1   : > { %4532 = vmatprep.subr.mxu1 %v4955_v2 }
 0x5e2   : > { %4533 = vmatpush3.msra.mxu1 %v3758_v48 }
 0x5e3   : > { %4534 = vmatprep.subr.mxu1 %v4955_v2 }
 0x5e4   : > { %4535 = vmatpush3.msra.mxu1 %v3757_v25 }
 0x5e5   : > { %4536 = vmatprep.subr.mxu1 %v4955_v2 }
 0x5e6   : > { %4537 = vmatpush3.msra.mxu1 %v3756_v43 }
 0x5e7   : > { %4538 = vmatprep.subr.mxu1 %v4955_v2 }
 0x5e8   : > { %4539 = vmatpush3.msra.mxu1 %v3755_v45 }
 0x5e9   : > { %4540 = vmatprep.subr.mxu1 %v4955_v2 }
 0x5ea   : > { %4541 = vmatpush3.msra.mxu1 %v3754_v1 }
 0x5eb   : > { %4542 = vmatprep.subr.mxu1 %v4955_v2 }
 0x5ec   : > { %4543 = vmatpush3.msra.mxu1 %v3753_v11 }
 0x5ed   : > { %4544 = vmatprep.subr.mxu1 %v4955_v2 }
 0x5ee   : > { %4545 = vmatpush3.msra.mxu1 %v3752_v41 }
 0x5ef   : > { %4546 = vmatprep.subr.mxu1 %v4955_v2 }
 0x5f0   : > { %4547 = vmatpush3.msra.mxu1 %v3751_v3 }
 0x5f1   : > { %4548 = vmatprep.subr.mxu1 %v4955_v2 }
 0x5f2   : > { %4549 = vmatpush3.msra.mxu1 %v3750_v63 }
 0x5f3   : > { %4550 = vmatprep.subr.mxu1 %v4955_v2 }
 0x5f4   : > { %4551 = vmatpush3.msra.mxu1 %v3749_v27  ;;  %v4759_v27 = vld [vmem:[%s5167_s18] sm:$0xff] }
 0x5f5   : > { %4552 = vmatprep.subr.mxu1 %v4955_v2  ;;  %v779_v62 = vrot.slane %v4759_v27, %v778_v40 }
 0x5f6   : > { %4553 = vmatpush3.msra.mxu1 %v3748_v38 }
 0x5f7   : > { %4554 = vmatprep.subr.mxu1 %v4955_v2 }
 0x5f8   : > { %4555 = vmatpush3.msra.mxu1 %v3747_v50  ;;  %v780_v50 = vadd.f32 %v779_v62, %v5588_v58 }
 0x68c   : > { %v3420_v26 = vpop.f32.mrf.mxu1 }
 0x68d   : > { %v3640_v51 = vmul.f32 %v3420_v26, %v780_v50  ;;  %v456_v26 = vld [vmem:[%s5167_s18 + $0x8] sm:$0xff] }
 0x68e   : > { %v4518_v57 = vpop.f32.mrf.mxu1 }
 0x68f   : > { %v3766_v57 = vrot.slane %v4759_v27, %v3765_v33 }
 0x699   : > { %v3582_v10 = vpop.f32.mrf.mxu1 }
 0x69a   : > { %v3587_v36 = vcombine.high %v3582_v10, %v3582_v10  ;;  %v3594_v56 = vrot.slane %v3582_v10, %v5368_v28 }
 0x69b   : > { %v4523_v53 = vpop.f32.mrf.mxu1 }
 0x69c   : > { %v3601_v47 = vrot.slane %v3587_v36, %v5368_v28  ;;  %v3602_v0 = vcombine.high %v3594_v56, %v3594_v56  ;;  %v3610_v34 = vrot.slane %v3594_v56, %v5368_v28 }
 0x69e   : > { %v3603_v8 = vcombine.high %v3601_v47, %v3601_v47  ;;  %v3617_v61 = vrot.slane %v3601_v47, %v5368_v28  ;;  %v3624_v13 = vrot.slane %v3602_v0, %v5368_v28  ;;  %v3632_v29 = vcombine.high %v3610_v34, %v3610_v34 }
 0x69f   : > { %v3668_v7 = vmul.f32 %v3656_v46, %v3610_v34 }
 0x6a0   : > { %v3631_v12 = vrot.slane %v3603_v8, %v5368_v28  ;;  %v3633_v23 = vcombine.high %v3624_v13, %v3624_v13  ;;  %v3669_v19 = vmul.f32 %v3663_v16, %v3624_v13  ;;  %v3670_v39 = vmul.f32 %v3664_v5, %v3632_v29 }
 0x6a1   : > { %v3672_v42 = vmul.f32 %v3663_v16, %v3617_v61  ;;  %v4760_v16 = vld [vmem:[%s5192_s9] sm:$0x3] }
 0x6a2   : > { %v3671_v54 = vmul.f32 %v3656_v46, %v3633_v23  ;;  %v3673_v60 = vmul.f32 %v3664_v5, %v3631_v12  ;;  %v3680_v15 = vcombine.low %v3668_v7, %v3669_v19  ;;  %v3694_v6 = vrot.slane %v3670_v39, %v5368_v28 }
 0x6a3   : > { %v3856_v46 = vrot.slane %v456_v26, %v5238_v21 }
 0x6a4   : > { %v3687_v44 = vrot.slane %v3680_v15, %v5368_v28  ;;  %v3703_v55 = vcombine.low %v3671_v54, %v3672_v42  ;;  %v3717_v49 = vrot.slane %v3673_v60, %v5368_v28 }
 0x6a6   : > { %v3695_v31 = vcombine.low %v3687_v44, %v3694_v6  ;;  %v3710_v59 = vrot.slane %v3703_v55, %v5368_v28 }
 0x6a8   : > { %v3702_v48 = vrot.slane %v3695_v31, %v5368_v28  ;;  %v3718_v25 = vcombine.low %v3710_v59, %v3717_v49 }
 0x6aa   : > { %v3725_v43 = vrot.slane %v3718_v25, %v5368_v28  ;;  %v3728_v45 = vsel %vm3109_vm15, %v3702_v48, 0.0 }
 0x6ab   : > { %v3729_v1 = vrot.slane %v3728_v45, 4 }
 0x6ac   : > { %v3735_v11 = vsel %vm3109_vm15, %v3725_v43, 0.0 }
 0x6ad   : > { %v3730_v41 = vadd.f32 %v3729_v1, %v3728_v45  ;;  %v3736_v52 = vrot.slane %v3735_v11, 4 }
 0x6af   : > { %v3731_v3 = vrot.slane %v3730_v41, 2  ;;  %v3737_v24 = vadd.f32 %v3736_v52, %v3735_v11 }
 0x6b1   : > { %v3732_v63 = vadd.f32 %v3731_v3, %v3730_v41  ;;  %v3738_v18 = vrot.slane %v3737_v24, 2 }
 0x6b3   : > { %v3733_v38 = vrot.slane %v3732_v63, 1  ;;  %v3739_v4 = vadd.f32 %v3738_v18, %v3737_v24 }
 0x6b5   : > { %v3740_v28 = vrot.slane %v3739_v4, 1  ;;  %v3734_v9 = vadd.f32 %v3733_v38, %v3732_v63 }
 0x6b7   : > { %v3741_v30 = vadd.f32 %v3740_v28, %v3739_v4 }
 0x6b9   : > { %v3744_v17 = vsel %vm2032_vm3, %v3741_v30, %v3734_v9 }
 0x6ba   : > { %v3746_v22 = vadd.f32 %v3744_v17, %v3640_v51 }
 0x6bc   : > { %4557 = vmatmul.mubr.f32.vlgmr.msra.gmra.mxu1 %v3746_v22 }
 0x77c   : > { %v3833_v58 = vpop.f32.mrf.mxu1 }
 0x77d   : > { %v3834_v35 = vadd.f32 %v3833_v58, %v3766_v57 }
 0x77e   : > { %v4558_v14 = vpop.f32.mrf.mxu1 }
 0x77f   : > { %4592 = vmatmul.mubr.f32.vlgmr.msra.gmra.mxu0 %v3834_v35 }
 0x83f   : > { %v3923_v10 = vpop.f32.mrf.mxu0 }
 0x840   : > { %v3924_v36 = vadd.f32 %v3923_v10, %v3856_v46 }
 0x841   : > { %v4593_v56 = vpop.f32.mrf.mxu0 }
 0x842   : > { %v3927_v53 = vadd.f32 %v4760_v16, %v3924_v36 }
 0x844   : > { %3928 = vst [vmem:[%s5192_s9] sm:$0x3] %v3927_v53 }
 0x845 PF: > { %s24_s8 = sadd.s32 1, %s4945_s8   ;;  %s6276_s6 = sld [smem:[#allocation13_spill]] }
 0x846   : > { %p21_p7 = scmp.ge.s32.totalorder %s24_s8, 6   ;;  %s6277_s23 = sld [smem:[#allocation14_spill]] }
 0x847   : > { %s6278_s24 = smov %s4921_s25  ;;  %s6279_s25 = smov %s4925_s26 }
 0x848   : > { %s6280_s26 = smov %s5068_s20  ;;  %s6281_s27 = smov %s4937_s29 }
 0x849   : > { %s6282_s28 = smov %s4941_s30  ;;  %23 = sbr.rel (!%p21_p7) target bundleno = 16 (0x10), region = 126 }
 0x84b   : > { %s6283_s29 = smov %s6276_s6 }
 0x84c   : > { %s6284_s30 = smov %s6277_s23 }
 0x84e   :  { %3948 = vsyncpa [#allocation3], 1 }
 0x84f   :  { %3950 = vsyncpa [#allocation3 + $0x1], 1 }
 0x850   :  { %3951 = vsyncpa [#allocation5], 1 }
 0x851   :  { %3953 = vsyncpa [#allocation5 + $0x1], 1 }
 0x852   :  { %3954 = vsyncpa [#allocation8], 1 }

</bundles_post_ra>
